<compile_context>
chip_gen: v5e
topology: v5e:2x2
jax: 0.10.0
libtpu: 0.0.40
codegen_flags: <defaults>
</compile_context>

<pallas_src>
import functools
import math

import jax
import jax.numpy as jnp
import numpy as np
from jax.experimental import pallas as pl
from jax.experimental.pallas import tpu as pltpu


# ------------------------------ in-kernel helpers ---------------------------

def _interleave_repeat(x, reps, axis):
    """Interleaved repeat ([a, a, b, b, ...]) along `axis` using static slices
    + concat, which lowers to plain sublane/lane copies in Mosaic."""
    if reps == 1:
        return x
    parts = []
    for i in range(x.shape[axis]):
        s = jax.lax.slice_in_dim(x, i, i + 1, axis=axis)
        parts.extend([s] * reps)
    return jnp.concatenate(parts, axis=axis)


# ------------------------------- Pallas kernels ------------------------------

def _ghost_kernel(*refs, relu, dw, mult, oup, attn):
    """primary_conv + cheap_operation + ghost concat (+ sigmoid gate) for one image."""
    if attn:
        x_ref, wp_ref, bp_ref, wc_ref, bc_ref, r_ref, o_ref, x1p_ref = refs
    else:
        x_ref, wp_ref, bp_ref, wc_ref, bc_ref, o_ref, x1p_ref = refs
        r_ref = None

    _, H, W, c1 = x_ref.shape
    ic = wp_ref.shape[1]
    nc = wc_ref.shape[1]
    p = dw // 2
    Hp, Wp = H + 2 * p, W + 2 * p

    # --- primary_conv: 1x1 conv (BN scale pre-folded into wp) + bias + ReLU --
    # bf16 MXU operands, f32 accumulation.
    x2d = x_ref[0].reshape(H * W, c1)
    x1 = jnp.dot(x2d.astype(jnp.bfloat16), wp_ref[...],
                 preferred_element_type=jnp.float32) + bp_ref[...]
    if relu:
        x1 = jnp.maximum(x1, 0.0)
    x1 = x1.reshape(H, W, ic)

    # --- cheap_operation: depthwise conv on x1; the zero-padded activation
    #     lives only in a VMEM scratch (never materialized in HBM). -----------
    if p > 0:
        zrow = jnp.zeros((p, Wp, nc), jnp.float32)
        zcol = jnp.zeros((Hp, p, nc), jnp.float32)
        x1p_ref[0:p, :, :] = zrow
        x1p_ref[p + H:Hp, :, :] = zrow
        x1p_ref[:, 0:p, :] = zcol
        x1p_ref[:, p + W:Wp, :] = zcol
    # grouped-conv channel duplication (ratio > 2) stays in VMEM
    x1p_ref[p:p + H, p:p + W, :] = _interleave_repeat(x1, mult, axis=2)

    acc = jnp.broadcast_to(bc_ref[0], (H, W, nc))
    # TODO(synk): the sublane-misaligned j-shifted reads could use pltpu.roll
    #             (XLU) instead of shifted static slices.
    for i in range(dw):
        for j in range(dw):
            acc = acc + x1p_ref[i:i + H, j:j + W, :] * wc_ref[i * dw + j]
    x2 = jnp.maximum(acc, 0.0) if relu else acc

    # --- ghost concat, written straight to the output block (no HBM concat) --
    out = jnp.concatenate([x1, x2], axis=-1)[:, :, :oup]

    if attn:
        # sigmoid gate at half resolution + fused 2x nearest-neighbour upsample
        g = jax.nn.sigmoid(r_ref[0])
        g = _interleave_repeat(g, 2, axis=0)
        g = _interleave_repeat(g, 2, axis=1)
        out = out * g

    o_ref[0] = out


def _short_conv_kernel(x_ref, w1_ref, b1_ref, w2_ref, b2_ref, w3_ref, b3_ref,
                       r_ref, rh_ref, rv_ref):
    """avg_pool2d(2,2) + 1x1 conv + (1,5) dw + (5,1) dw (all BN-folded),
    producing the half-resolution gate logits for one image."""
    _, H, Ws, twoc1 = x_ref.shape     # x arrives with W pixel-pairs folded into lanes
    Hs = H // 2
    c2 = w1_ref.shape[1]

    # --- 2x2 avg-pool fused into the 1x1 conv --------------------------------
    # vertical pair-sum via a free leading-dim split; the horizontal pair-sum
    # and the 0.25 factor are folded into the duplicated, pre-scaled weights
    # so they happen inside the MXU contraction.
    v = x_ref[0].reshape(Hs, 2, Ws, twoc1)
    vs = v[:, 0] + v[:, 1]                                   # (Hs, Ws, 2*c1)
    r1 = jnp.dot(vs.reshape(Hs * Ws, twoc1).astype(jnp.bfloat16), w1_ref[...],
                 preferred_element_type=jnp.float32) + b1_ref[...]
    r1 = r1.reshape(Hs, Ws, c2)

    # --- (1, 5) depthwise, padding (0, 2), padded rows live in VMEM only -----
    zc = jnp.zeros((Hs, 2, c2), jnp.float32)
    rh_ref[:, 0:2, :] = zc
    rh_ref[:, 2 + Ws:4 + Ws, :] = zc
    rh_ref[:, 2:2 + Ws, :] = r1
    r2 = jnp.broadcast_to(b2_ref[0], (Hs, Ws, c2))
    for j in range(5):
        r2 = r2 + rh_ref[:, j:j + Ws, :] * w2_ref[j]

    # --- (5, 1) depthwise, padding (2, 0) -------------------------------------
    zr = jnp.zeros((2, Ws, c2), jnp.float32)
    rv_ref[0:2, :, :] = zr
    rv_ref[2 + Hs:4 + Hs, :, :] = zr
    rv_ref[2:2 + Hs, :, :] = r2
    r3 = jnp.broadcast_to(b3_ref[0], (Hs, Ws, c2))
    for i in range(5):
        r3 = r3 + rv_ref[i:i + Hs, :, :] * w3_ref[i]

    r_ref[0] = r3


# --------------------------- parameters & module -----------------------------

def _bn_fold_params(key, c):
    """Deterministic eval-mode BatchNorm params folded into per-channel scale/bias."""
    k1, k2, k3, k4 = jax.random.split(key, 4)
    gamma = 1.0 + 0.1 * jax.random.normal(k1, (c,), jnp.float32)
    beta = 0.1 * jax.random.normal(k2, (c,), jnp.float32)
    mean = 0.1 * jax.random.normal(k3, (c,), jnp.float32)
    var = 1.0 + 0.1 * jnp.abs(jax.random.normal(k4, (c,), jnp.float32))
    scale = gamma * jax.lax.rsqrt(var + 1e-5)
    bias = beta - mean * scale
    return scale, bias


class GhostModuleV2Pallas:
    # TODO(synk): BatchNorm implemented in eval mode (running stats folded into
    #             an affine); training-mode batch statistics are not implemented.
    def __init__(self, c1, c2, kernel_size=1, ratio=2, dw_size=3, stride=1,
                 relu=True, mode='original', key=None):
        assert kernel_size == 1 and stride == 1, \
            "only the default kernel_size=1 / stride=1 configuration is implemented"
        self.mode = mode
        self.oup = c2
        self.relu = relu
        self.dw_size = dw_size
        self.init_channels = math.ceil(c2 / ratio)
        self.new_channels = self.init_channels * (ratio - 1)
        self.mult = ratio - 1  # depthwise multiplier of cheap_operation

        key = jax.random.PRNGKey(0) if key is None else key
        ks = jax.random.split(key, 10)
        ic, nc = self.init_channels, self.new_channels

        # raw parameters (used by the pure-JAX reference)
        self.w_primary = 0.3 * jax.random.normal(ks[0], (c1, ic), jnp.float32)
        self.s_primary, self.b_primary = _bn_fold_params(ks[1], ic)
        self.w_cheap = 0.3 * jax.random.normal(ks[2], (dw_size * dw_size, nc), jnp.float32)
        self.s_cheap, self.b_cheap = _bn_fold_params(ks[3], nc)
        self.w_s1 = 0.3 * jax.random.normal(ks[4], (c1, c2), jnp.float32)
        self.s_s1, self.b_s1 = _bn_fold_params(ks[5], c2)
        self.w_s2 = 0.3 * jax.random.normal(ks[6], (1 * 5, c2), jnp.float32)
        self.s_s2, self.b_s2 = _bn_fold_params(ks[7], c2)
        self.w_s3 = 0.3 * jax.random.normal(ks[8], (5 * 1, c2), jnp.float32)
        self.s_s3, self.b_s3 = _bn_fold_params(ks[9], c2)

        # kernel-side parameters: BN scale folded into the conv weights at
        # trace time (only the bias add remains in-kernel).  1x1 conv weights
        # become bf16 MXU operands; depthwise weights stay f32 (VPU path).
        self.wp_k = (self.w_primary * self.s_primary[None, :]).astype(jnp.bfloat16)
        self.bp_k = self.b_primary.reshape(1, ic)
        self.wc_k = self.w_cheap * self.s_cheap[None, :]
        self.bc_k = self.b_cheap.reshape(1, nc)
        w1 = self.w_s1 * self.s_s1[None, :]
        # duplicate rows and absorb the 0.25 avg-pool factor so the horizontal
        # half of the pooling happens inside the short_conv 1x1 contraction.
        self.w1_k = (0.25 * jnp.concatenate([w1, w1], axis=0)).astype(jnp.bfloat16)
        self.b1_k = self.b_s1.reshape(1, c2)
        self.w2_k = self.w_s2 * self.s_s2[None, :]
        self.b2_k = self.b_s2.reshape(1, c2)
        self.w3_k = self.w_s3 * self.s_s3[None, :]
        self.b3_k = self.b_s3.reshape(1, c2)

    # ------------------------- Pallas forward pieces -------------------------
    def _short_conv_gate(self, x):
        """x: (N, H, W, c1) NHWC -> half-resolution gate logits (N, H//2, W//2, c2)."""
        N, H, W, c1 = x.shape
        # TODO(synk): floor-mode avg_pool2d / nearest resize for odd H, W not handled.
        assert H % 2 == 0 and W % 2 == 0
        Hs, Ws = H // 2, W // 2
        c2 = self.oup
        # Fold W pixel-pairs into lanes (free row-major view, done by XLA) so the
        # horizontal pool is absorbed by the matmul contraction in-kernel.
        x_pairs = x.reshape(N, H, Ws, 2 * c1)
        flops = 2 * N * Hs * Ws * (2 * c1) * c2 + 2 * N * Hs * Ws * 5 * c2 * 2 \
            + N * Hs * Ws * 2 * c1
        bytes_accessed = 4 * (x.size + N * Hs * Ws * c2) \
            + 2 * self.w1_k.size + 4 * (self.w2_k.size + self.w3_k.size + 3 * c2)
        return pl.pallas_call(
            _short_conv_kernel,
            out_shape=jax.ShapeDtypeStruct((N, Hs, Ws, c2), jnp.float32),
            grid=(N,),
            in_specs=[
                pl.BlockSpec((1, H, Ws, 2 * c1), lambda n: (n, 0, 0, 0)),
                pl.BlockSpec((2 * c1, c2), lambda n: (0, 0)),
                pl.BlockSpec((1, c2), lambda n: (0, 0)),
                pl.BlockSpec((5, c2), lambda n: (0, 0)),
                pl.BlockSpec((1, c2), lambda n: (0, 0)),
                pl.BlockSpec((5, c2), lambda n: (0, 0)),
                pl.BlockSpec((1, c2), lambda n: (0, 0)),
            ],
            out_specs=pl.BlockSpec((1, Hs, Ws, c2), lambda n: (n, 0, 0, 0)),
            scratch_shapes=[pltpu.VMEM((Hs, Ws + 4, c2), jnp.float32),
                            pltpu.VMEM((Hs + 4, Ws, c2), jnp.float32)],
            compiler_params=pltpu.CompilerParams(dimension_semantics=("parallel",)),
            cost_estimate=pl.CostEstimate(flops=int(flops), transcendentals=0,
                                          bytes_accessed=int(bytes_accessed)),
        )(x_pairs, self.w1_k, self.b1_k, self.w2_k, self.b2_k, self.w3_k, self.b3_k)

    def _ghost(self, x, r):
        N, H, W, c1 = x.shape
        ic, nc, oup = self.init_channels, self.new_channels, self.oup
        dwk, p = self.dw_size, self.dw_size // 2
        attn = r is not None
        kernel = functools.partial(_ghost_kernel, relu=self.relu, dw=dwk,
                                   mult=self.mult, oup=oup, attn=attn)
        in_specs = [
            pl.BlockSpec((1, H, W, c1), lambda n: (n, 0, 0, 0)),
            pl.BlockSpec((c1, ic), lambda n: (0, 0)),
            pl.BlockSpec((1, ic), lambda n: (0, 0)),
            pl.BlockSpec((dwk * dwk, nc), lambda n: (0, 0)),
            pl.BlockSpec((1, nc), lambda n: (0, 0)),
        ]
        args = [x, self.wp_k, self.bp_k, self.wc_k, self.bc_k]
        if attn:
            Hs, Ws = r.shape[1], r.shape[2]
            in_specs.append(pl.BlockSpec((1, Hs, Ws, oup), lambda n: (n, 0, 0, 0)))
            args.append(r)
        flops = 2 * N * H * W * c1 * ic + 2 * N * H * W * dwk * dwk * nc \
            + 4 * N * H * W * oup
        trans = (N * (H // 2) * (W // 2) * oup) if attn else 0
        bytes_accessed = 4 * (x.size + N * H * W * oup) + (4 * r.size if attn else 0) \
            + 2 * self.wp_k.size + 4 * self.wc_k.size + 4 * (ic + nc)
        return pl.pallas_call(
            kernel,
            out_shape=jax.ShapeDtypeStruct((N, H, W, oup), jnp.float32),
            grid=(N,),
            in_specs=in_specs,
            out_specs=pl.BlockSpec((1, H, W, oup), lambda n: (n, 0, 0, 0)),
            scratch_shapes=[pltpu.VMEM((H + 2 * p, W + 2 * p, nc), jnp.float32)],
            compiler_params=pltpu.CompilerParams(dimension_semantics=("parallel",)),
            cost_estimate=pl.CostEstimate(flops=int(flops), transcendentals=int(trans),
                                          bytes_accessed=int(bytes_accessed)),
        )(*args)

    def __call__(self, x_nchw):
        x = jnp.transpose(x_nchw.astype(jnp.float32), (0, 2, 3, 1))  # NCHW -> NHWC
        r = self._short_conv_gate(x) if self.mode == 'attn' else None
        out = self._ghost(x, r)
        return jnp.transpose(out, (0, 3, 1, 2))  # NHWC -> NCHW

    # --------------- pure-JAX reference (for validation) ---------------
    def reference(self, x_nchw):
        x = jnp.transpose(x_nchw.astype(jnp.float32), (0, 2, 3, 1))

        def pw(xx, w, s, b, relu):
            y = jax.lax.conv_general_dilated(
                xx, w.reshape(1, 1, *w.shape), (1, 1), 'VALID',
                dimension_numbers=('NHWC', 'HWIO', 'NHWC'))
            y = y * s + b
            return jnp.maximum(y, 0.0) if relu else y

        def dw(xx, w, s, b, kh, kw, ph, pw_, relu):
            cin = xx.shape[-1]
            cout = w.shape[-1]
            y = jax.lax.conv_general_dilated(
                xx, w.reshape(kh, kw, 1, cout), (1, 1), ((ph, ph), (pw_, pw_)),
                dimension_numbers=('NHWC', 'HWIO', 'NHWC'),
                feature_group_count=cin)
            y = y * s + b
            return jnp.maximum(y, 0.0) if relu else y

        d = self.dw_size
        x1 = pw(x, self.w_primary, self.s_primary, self.b_primary, self.relu)
        x1_in = jnp.repeat(x1, self.mult, axis=-1) if self.mult > 1 else x1
        x2 = dw(x1_in, self.w_cheap, self.s_cheap, self.b_cheap, d, d, d // 2, d // 2, self.relu)
        out = jnp.concatenate([x1, x2], axis=-1)[..., :self.oup]
        if self.mode == 'attn':
            N, H, W, C = x.shape
            xp = x.reshape(N, H // 2, 2, W // 2, 2, C).mean(axis=(2, 4))
            r = pw(xp, self.w_s1, self.s_s1, self.b_s1, False)
            r = dw(r, self.w_s2, self.s_s2, self.b_s2, 1, 5, 0, 2, False)
            r = dw(r, self.w_s3, self.s_s3, self.b_s3, 5, 1, 2, 0, False)
            g = jax.nn.sigmoid(r)
            g = jnp.repeat(jnp.repeat(g, 2, axis=1), 2, axis=2)
            out = out * g
        return jnp.transpose(out, (0, 3, 1, 2))


# --------------------------------- main --------------------------------------

if __name__ == "__main__":
    key = jax.random.PRNGKey(0)
    kx, kparam = jax.random.split(key)
    x = jax.random.normal(kx, (2, 4, 16, 16), jnp.float32)  # NCHW, like the PyTorch input

    for mode in ("original", "attn"):
        mod = GhostModuleV2Pallas(c1=4, c2=8, kernel_size=1, ratio=2, dw_size=3,
                                  stride=1, relu=True, mode=mode, key=kparam)
        fwd = jax.jit(mod.__call__)
        y = jax.block_until_ready(fwd(x))
        assert y.shape == (2, 8, 16, 16), y.shape
        y_ref = jax.block_until_ready(mod.reference(x))
        np.testing.assert_allclose(np.asarray(y), np.asarray(y_ref), rtol=5e-2, atol=5e-2)

    print("KERNEL_OK")
</pallas_src>

<mosaic_0001>
module attributes {stable_mosaic.version = 11 : i64} {
  func.func @_ghost_kernel(%arg0: i32, %arg1: memref<1x16x16x4xf32, #tpu.memory_space<vmem>>, %arg2: memref<4x4xbf16, #tpu.memory_space<vmem>>, %arg3: memref<1x4xf32, #tpu.memory_space<vmem>>, %arg4: memref<9x4xf32, #tpu.memory_space<vmem>>, %arg5: memref<1x4xf32, #tpu.memory_space<vmem>>, %arg6: memref<1x16x16x8xf32, #tpu.memory_space<vmem>>, %arg7: memref<18x18x4xf32, #tpu.memory_space<vmem>>) attributes {dimension_semantics = [#tpu.dimension_semantics<parallel>], iteration_bounds = array<i64: 2>, scalar_prefetch = 0 : i64, scratch_operands = 1 : i64, tpu.core_type = #tpu.core_type<tc>, window_params = [{transform_indices = @transform_0, window_bounds = array<i64: 1, 16, 16, 4>}, {pipeline_mode = #tpu.pipeline_mode<synchronous>, transform_indices = @transform_1, window_bounds = array<i64: 4, 4>}, {pipeline_mode = #tpu.pipeline_mode<synchronous>, transform_indices = @transform_2, window_bounds = array<i64: 1, 4>}, {pipeline_mode = #tpu.pipeline_mode<synchronous>, transform_indices = @transform_3, window_bounds = array<i64: 9, 4>}, {pipeline_mode = #tpu.pipeline_mode<synchronous>, transform_indices = @transform_4, window_bounds = array<i64: 1, 4>}, {transform_indices = @transform_5, window_bounds = array<i64: 1, 16, 16, 8>}]} {
    %c0 = arith.constant 0 : index
    %c0_0 = arith.constant 0 : index
    %c0_1 = arith.constant 0 : index
    %c0_2 = arith.constant 0 : index
    %0 = vector.load %arg1[%c0, %c0_0, %c0_1, %c0_2] : memref<1x16x16x4xf32, #tpu.memory_space<vmem>>, vector<1x16x16x4xf32>
    %1 = vector.shape_cast %0 : vector<1x16x16x4xf32> to vector<16x16x4xf32>
    %2 = vector.shape_cast %1 : vector<16x16x4xf32> to vector<256x4xf32>
    %3 = arith.truncf %2 : vector<256x4xf32> to vector<256x4xbf16>
    %c0_3 = arith.constant 0 : index
    %c0_4 = arith.constant 0 : index
    %4 = vector.load %arg2[%c0_3, %c0_4] : memref<4x4xbf16, #tpu.memory_space<vmem>>, vector<4x4xbf16>
    %cst = arith.constant dense<0.000000e+00> : vector<256x4xf32>
    %5 = tpu.matmul %3, %4, %cst {dimension_numbers = #tpu.dot_dimension_numbers<[1], [0], [0], [1], [0, 0, 1, 1], [], []>} : vector<256x4xbf16>, vector<4x4xbf16>, vector<256x4xf32> -> vector<256x4xf32>
    %c0_5 = arith.constant 0 : index
    %c0_6 = arith.constant 0 : index
    %6 = vector.load %arg3[%c0_5, %c0_6] : memref<1x4xf32, #tpu.memory_space<vmem>>, vector<1x4xf32>
    %7 = vector.broadcast %6 : vector<1x4xf32> to vector<256x4xf32>
    %8 = arith.addf %5, %7 : vector<256x4xf32>
    %cst_7 = arith.constant 0.000000e+00 : f32
    %9 = vector.broadcast %cst_7 : f32 to vector<256x4xf32>
    %10 = arith.maximumf %8, %9 : vector<256x4xf32>
    %11 = vector.shape_cast %10 : vector<256x4xf32> to vector<16x16x4xf32>
    %cst_8 = arith.constant 0.000000e+00 : f32
    %12 = vector.broadcast %cst_8 : f32 to vector<1x18x4xf32>
    %cst_9 = arith.constant 0.000000e+00 : f32
    %13 = vector.broadcast %cst_9 : f32 to vector<18x1x4xf32>
    %c0_10 = arith.constant 0 : index
    %c0_11 = arith.constant 0 : index
    %c0_12 = arith.constant 0 : index
    %14 = vector.load %arg7[%c0_10, %c0_11, %c0_12] : memref<18x18x4xf32, #tpu.memory_space<vmem>>, vector<1x18x4xf32>
    tpu.vector_store %arg7[%c0_10, %c0_11, %c0_12], %12 {strides = array<i32>} : memref<18x18x4xf32, #tpu.memory_space<vmem>>, vector<1x18x4xf32>,
    %c17 = arith.constant 17 : index
    %c0_13 = arith.constant 0 : index
    %c0_14 = arith.constant 0 : index
    %15 = vector.load %arg7[%c17, %c0_13, %c0_14] : memref<18x18x4xf32, #tpu.memory_space<vmem>>, vector<1x18x4xf32>
    tpu.vector_store %arg7[%c17, %c0_13, %c0_14], %12 {strides = array<i32>} : memref<18x18x4xf32, #tpu.memory_space<vmem>>, vector<1x18x4xf32>,
    %c0_15 = arith.constant 0 : index
    %c0_16 = arith.constant 0 : index
    %c0_17 = arith.constant 0 : index
    %16 = vector.load %arg7[%c0_15, %c0_16, %c0_17] : memref<18x18x4xf32, #tpu.memory_space<vmem>>, vector<18x1x4xf32>
    tpu.vector_store %arg7[%c0_15, %c0_16, %c0_17], %13 {strides = array<i32>} : memref<18x18x4xf32, #tpu.memory_space<vmem>>, vector<18x1x4xf32>,
    %c0_18 = arith.constant 0 : index
    %c17_19 = arith.constant 17 : index
    %c0_20 = arith.constant 0 : index
    %17 = vector.load %arg7[%c0_18, %c17_19, %c0_20] : memref<18x18x4xf32, #tpu.memory_space<vmem>>, vector<18x1x4xf32>
    tpu.vector_store %arg7[%c0_18, %c17_19, %c0_20], %13 {strides = array<i32>} : memref<18x18x4xf32, #tpu.memory_space<vmem>>, vector<18x1x4xf32>,
    %c1 = arith.constant 1 : index
    %c1_21 = arith.constant 1 : index
    %c0_22 = arith.constant 0 : index
    %18 = vector.load %arg7[%c1, %c1_21, %c0_22] : memref<18x18x4xf32, #tpu.memory_space<vmem>>, vector<16x16x4xf32>
    tpu.vector_store %arg7[%c1, %c1_21, %c0_22], %11 {strides = array<i32>} : memref<18x18x4xf32, #tpu.memory_space<vmem>>, vector<16x16x4xf32>,
    %c0_23 = arith.constant 0 : index
    %c0_24 = arith.constant 0 : index
    %19 = vector.load %arg5[%c0_23, %c0_24] : memref<1x4xf32, #tpu.memory_space<vmem>>, vector<1x4xf32>
    %20 = vector.shape_cast %19 : vector<1x4xf32> to vector<4xf32>
    %21 = vector.shape_cast %20 : vector<4xf32> to vector<1x1x4xf32>
    %22 = vector.broadcast %21 : vector<1x1x4xf32> to vector<16x16x4xf32>
    %c0_25 = arith.constant 0 : index
    %c0_26 = arith.constant 0 : index
    %c0_27 = arith.constant 0 : index
    %23 = vector.load %arg7[%c0_25, %c0_26, %c0_27] : memref<18x18x4xf32, #tpu.memory_space<vmem>>, vector<16x16x4xf32>
    %c0_28 = arith.constant 0 : index
    %c0_29 = arith.constant 0 : index
    %24 = vector.load %arg4[%c0_28, %c0_29] : memref<9x4xf32, #tpu.memory_space<vmem>>, vector<1x4xf32>
    %25 = vector.shape_cast %24 : vector<1x4xf32> to vector<4xf32>
    %26 = vector.shape_cast %25 : vector<4xf32> to vector<1x1x4xf32>
    %27 = vector.broadcast %26 : vector<1x1x4xf32> to vector<16x16x4xf32>
    %28 = arith.mulf %23, %27 : vector<16x16x4xf32>
    %29 = arith.addf %22, %28 : vector<16x16x4xf32>
    %c0_30 = arith.constant 0 : index
    %c1_31 = arith.constant 1 : index
    %c0_32 = arith.constant 0 : index
    %30 = vector.load %arg7[%c0_30, %c1_31, %c0_32] : memref<18x18x4xf32, #tpu.memory_space<vmem>>, vector<16x16x4xf32>
    %c1_33 = arith.constant 1 : index
    %c0_34 = arith.constant 0 : index
    %31 = vector.load %arg4[%c1_33, %c0_34] : memref<9x4xf32, #tpu.memory_space<vmem>>, vector<1x4xf32>
    %32 = vector.shape_cast %31 : vector<1x4xf32> to vector<4xf32>
    %33 = vector.shape_cast %32 : vector<4xf32> to vector<1x1x4xf32>
    %34 = vector.broadcast %33 : vector<1x1x4xf32> to vector<16x16x4xf32>
    %35 = arith.mulf %30, %34 : vector<16x16x4xf32>
    %36 = arith.addf %29, %35 : vector<16x16x4xf32>
    %c0_35 = arith.constant 0 : index
    %c2 = arith.constant 2 : index
    %c0_36 = arith.constant 0 : index
    %37 = vector.load %arg7[%c0_35, %c2, %c0_36] : memref<18x18x4xf32, #tpu.memory_space<vmem>>, vector<16x16x4xf32>
    %c2_37 = arith.constant 2 : index
    %c0_38 = arith.constant 0 : index
    %38 = vector.load %arg4[%c2_37, %c0_38] : memref<9x4xf32, #tpu.memory_space<vmem>>, vector<1x4xf32>
    %39 = vector.shape_cast %38 : vector<1x4xf32> to vector<4xf32>
    %40 = vector.shape_cast %39 : vector<4xf32> to vector<1x1x4xf32>
    %41 = vector.broadcast %40 : vector<1x1x4xf32> to vector<16x16x4xf32>
    %42 = arith.mulf %37, %41 : vector<16x16x4xf32>
    %43 = arith.addf %36, %42 : vector<16x16x4xf32>
    %c1_39 = arith.constant 1 : index
    %c0_40 = arith.constant 0 : index
    %c0_41 = arith.constant 0 : index
    %44 = vector.load %arg7[%c1_39, %c0_40, %c0_41] : memref<18x18x4xf32, #tpu.memory_space<vmem>>, vector<16x16x4xf32>
    %c3 = arith.constant 3 : index
    %c0_42 = arith.constant 0 : index
    %45 = vector.load %arg4[%c3, %c0_42] : memref<9x4xf32, #tpu.memory_space<vmem>>, vector<1x4xf32>
    %46 = vector.shape_cast %45 : vector<1x4xf32> to vector<4xf32>
    %47 = vector.shape_cast %46 : vector<4xf32> to vector<1x1x4xf32>
    %48 = vector.broadcast %47 : vector<1x1x4xf32> to vector<16x16x4xf32>
    %49 = arith.mulf %44, %48 : vector<16x16x4xf32>
    %50 = arith.addf %43, %49 : vector<16x16x4xf32>
    %c1_43 = arith.constant 1 : index
    %c1_44 = arith.constant 1 : index
    %c0_45 = arith.constant 0 : index
    %51 = vector.load %arg7[%c1_43, %c1_44, %c0_45] : memref<18x18x4xf32, #tpu.memory_space<vmem>>, vector<16x16x4xf32>
    %c4 = arith.constant 4 : index
    %c0_46 = arith.constant 0 : index
    %52 = vector.load %arg4[%c4, %c0_46] : memref<9x4xf32, #tpu.memory_space<vmem>>, vector<1x4xf32>
    %53 = vector.shape_cast %52 : vector<1x4xf32> to vector<4xf32>
    %54 = vector.shape_cast %53 : vector<4xf32> to vector<1x1x4xf32>
    %55 = vector.broadcast %54 : vector<1x1x4xf32> to vector<16x16x4xf32>
    %56 = arith.mulf %51, %55 : vector<16x16x4xf32>
    %57 = arith.addf %50, %56 : vector<16x16x4xf32>
    %c1_47 = arith.constant 1 : index
    %c2_48 = arith.constant 2 : index
    %c0_49 = arith.constant 0 : index
    %58 = vector.load %arg7[%c1_47, %c2_48, %c0_49] : memref<18x18x4xf32, #tpu.memory_space<vmem>>, vector<16x16x4xf32>
    %c5 = arith.constant 5 : index
    %c0_50 = arith.constant 0 : index
    %59 = vector.load %arg4[%c5, %c0_50] : memref<9x4xf32, #tpu.memory_space<vmem>>, vector<1x4xf32>
    %60 = vector.shape_cast %59 : vector<1x4xf32> to vector<4xf32>
    %61 = vector.shape_cast %60 : vector<4xf32> to vector<1x1x4xf32>
    %62 = vector.broadcast %61 : vector<1x1x4xf32> to vector<16x16x4xf32>
    %63 = arith.mulf %58, %62 : vector<16x16x4xf32>
    %64 = arith.addf %57, %63 : vector<16x16x4xf32>
    %c2_51 = arith.constant 2 : index
    %c0_52 = arith.constant 0 : index
    %c0_53 = arith.constant 0 : index
    %65 = vector.load %arg7[%c2_51, %c0_52, %c0_53] : memref<18x18x4xf32, #tpu.memory_space<vmem>>, vector<16x16x4xf32>
    %c6 = arith.constant 6 : index
    %c0_54 = arith.constant 0 : index
    %66 = vector.load %arg4[%c6, %c0_54] : memref<9x4xf32, #tpu.memory_space<vmem>>, vector<1x4xf32>
    %67 = vector.shape_cast %66 : vector<1x4xf32> to vector<4xf32>
    %68 = vector.shape_cast %67 : vector<4xf32> to vector<1x1x4xf32>
    %69 = vector.broadcast %68 : vector<1x1x4xf32> to vector<16x16x4xf32>
    %70 = arith.mulf %65, %69 : vector<16x16x4xf32>
    %71 = arith.addf %64, %70 : vector<16x16x4xf32>
    %c2_55 = arith.constant 2 : index
    %c1_56 = arith.constant 1 : index
    %c0_57 = arith.constant 0 : index
    %72 = vector.load %arg7[%c2_55, %c1_56, %c0_57] : memref<18x18x4xf32, #tpu.memory_space<vmem>>, vector<16x16x4xf32>
    %c7 = arith.constant 7 : index
    %c0_58 = arith.constant 0 : index
    %73 = vector.load %arg4[%c7, %c0_58] : memref<9x4xf32, #tpu.memory_space<vmem>>, vector<1x4xf32>
    %74 = vector.shape_cast %73 : vector<1x4xf32> to vector<4xf32>
    %75 = vector.shape_cast %74 : vector<4xf32> to vector<1x1x4xf32>
    %76 = vector.broadcast %75 : vector<1x1x4xf32> to vector<16x16x4xf32>
    %77 = arith.mulf %72, %76 : vector<16x16x4xf32>
    %78 = arith.addf %71, %77 : vector<16x16x4xf32>
    %c2_59 = arith.constant 2 : index
    %c2_60 = arith.constant 2 : index
    %c0_61 = arith.constant 0 : index
    %79 = vector.load %arg7[%c2_59, %c2_60, %c0_61] : memref<18x18x4xf32, #tpu.memory_space<vmem>>, vector<16x16x4xf32>
    %c8 = arith.constant 8 : index
    %c0_62 = arith.constant 0 : index
    %80 = vector.load %arg4[%c8, %c0_62] : memref<9x4xf32, #tpu.memory_space<vmem>>, vector<1x4xf32>
    %81 = vector.shape_cast %80 : vector<1x4xf32> to vector<4xf32>
    %82 = vector.shape_cast %81 : vector<4xf32> to vector<1x1x4xf32>
    %83 = vector.broadcast %82 : vector<1x1x4xf32> to vector<16x16x4xf32>
    %84 = arith.mulf %79, %83 : vector<16x16x4xf32>
    %85 = arith.addf %78, %84 : vector<16x16x4xf32>
    %cst_63 = arith.constant 0.000000e+00 : f32
    %86 = vector.broadcast %cst_63 : f32 to vector<16x16x4xf32>
    %87 = arith.maximumf %85, %86 : vector<16x16x4xf32>
    %88 = tpu.concatenate %11, %87 in 2 : vector<16x16x4xf32>, vector<16x16x4xf32> -> vector<16x16x8xf32>
    %c0_64 = arith.constant 0 : index
    %c0_65 = arith.constant 0 : index
    %c0_66 = arith.constant 0 : index
    %c0_67 = arith.constant 0 : index
    %89 = vector.load %arg6[%c0_64, %c0_65, %c0_66, %c0_67] : memref<1x16x16x8xf32, #tpu.memory_space<vmem>>, vector<1x16x16x8xf32>
    %90 = vector.shape_cast %89 : vector<1x16x16x8xf32> to vector<16x16x8xf32>
    %91 = vector.shape_cast %88 : vector<16x16x8xf32> to vector<1x16x16x8xf32>
    tpu.vector_store %arg6[%c0_64, %c0_65, %c0_66, %c0_67], %91 {strides = array<i32>} : memref<1x16x16x8xf32, #tpu.memory_space<vmem>>, vector<1x16x16x8xf32>,
    return
  }
  func.func @transform_0(%arg0: i32) -> (i32, i32, i32, i32) {
    %c0_i32 = arith.constant 0 : i32
    %c0_i32_0 = arith.constant 0 : i32
    %c0_i32_1 = arith.constant 0 : i32
    %c0_i32_2 = arith.constant 0 : i32
    return %arg0, %c0_i32, %c0_i32_0, %c0_i32_1 : i32, i32, i32, i32
  }
  func.func @transform_1(%arg0: i32) -> (i32, i32) {
    %c0_i32 = arith.constant 0 : i32
    %c0_i32_0 = arith.constant 0 : i32
    %c0_i32_1 = arith.constant 0 : i32
    return %c0_i32, %c0_i32_0 : i32, i32
  }
  func.func @transform_2(%arg0: i32) -> (i32, i32) {
    %c0_i32 = arith.constant 0 : i32
    %c0_i32_0 = arith.constant 0 : i32
    %c0_i32_1 = arith.constant 0 : i32
    return %c0_i32, %c0_i32_0 : i32, i32
  }
  func.func @transform_3(%arg0: i32) -> (i32, i32) {
    %c0_i32 = arith.constant 0 : i32
    %c0_i32_0 = arith.constant 0 : i32
    %c0_i32_1 = arith.constant 0 : i32
    return %c0_i32, %c0_i32_0 : i32, i32
  }
  func.func @transform_4(%arg0: i32) -> (i32, i32) {
    %c0_i32 = arith.constant 0 : i32
    %c0_i32_0 = arith.constant 0 : i32
    %c0_i32_1 = arith.constant 0 : i32
    return %c0_i32, %c0_i32_0 : i32, i32
  }
  func.func @transform_5(%arg0: i32) -> (i32, i32, i32, i32) {
    %c0_i32 = arith.constant 0 : i32
    %c0_i32_0 = arith.constant 0 : i32
    %c0_i32_1 = arith.constant 0 : i32
    %c0_i32_2 = arith.constant 0 : i32
    return %arg0, %c0_i32, %c0_i32_0, %c0_i32_1 : i32, i32, i32, i32
  }
}

</mosaic_0001>

<bundles_post_ra>
// kernel: a_call__.1
= control target key start
LH: loop header
LB: loop body
LE: loop exit
PB: predicated region body
PF: predicated region fallthrough
CT: control target
= control target key end

     0   :  { %s1809_s18 = smov 0   ;;  %s3186_s0 = inlined_call_operand.vmem [shape: f32[2,16,16,4], index: 0, kind: input, shape index: {}]   ;;  %s3187_s1 = inlined_call_operand.vmem [shape: bf16[4,4], index: 1, kind: input, shape index: {}]   ;;  %s3188_s2 = inlined_call_operand.vmem [shape: f32[1,4], index: 2, kind: input, shape index: {}]   ;;  %s3189_s3 = inlined_call_operand.vmem [shape: f32[9,4], index: 3, kind: input, shape index: {}]   ;;  %s3190_s4 = inlined_call_operand.vmem [shape: f32[1,4], index: 4, kind: input, shape index: {}]   ;;  %s3191_s5 = inlined_call_operand.vmem [shape: f32[2,16,16,8], index: 5, kind: output, shape index: {}]  }
   0x1 LB: > { %s1698_s19 = sadd.s32 4294967295, %s1775_s18   ;;  %p1702_p0 = scmp.ge.s32.totalorder %s1775_s18, 1  ;;  %s1775_s18 = sphi %s1809_s18, %s15_s18  }
   0x2   : > { %p187_p1 = scmp.lt.s32.totalorder %s1775_s18, 3 }
   0x4   : > { %p188_p2 = pnand %p1702_p0, %p187_p1 }
   0x6   : > { %191 = sbr.rel (%p188_p2) target bundleno = 469 (0x1d5), region = 40 }
   0xb   : > { %v274_v0 = vld [vmem:[%s3187_s1] sm:$0x3]  ;;  %vm328_vm0 = vcmask 1041408   ;;  %p215_p3 = scmp.lt.s32.totalorder %s1698_s19, 1  ;;  %vm279_vm1 = vcmask 31744   ;;  %v1777_v50 = vmov 0.0  }
   0xc   : > { %v330_v1 = vsel %vm328_vm0, %v274_v0, 0  ;;  %453 = vst.msk [vmem:[#allocation2] sm:$0xff] %vm279_vm1, %v1777_v50  ;;  %vm461_vm2 = vcmask 24576   ;;  %v1933_v51 = vld [vmem:[%s3189_s3] ss:$0 sm:$0xff]  ;;  %vm455_vm3 = vcmask 25600  }
   0xd   : > { %339 = vmatpush.bf16.msra.mxu0 %v330_v1  ;;  %1727 = vmatpush.bf16.msra.mxu1 %v330_v1  ;;  %s3438_s19 = smov (!%p215_p3, %s1698_s19), 1  ;;  %454 = vst.msk [vmem:[#allocation2 + $0x8] sm:$0xff] %vm279_vm1, %v1777_v50  ;;  %v1940_v52 = vld [vmem:[%s3188_s2] ss:$0 sm:$0xff]  ;;  %v1957_v57 = vld [vmem:[%s3189_s3 + $0x1] ss:$0 sm:$0xff] }
   0xe   : > { %1728 = vmatpush.bf16.msra.mxu2 %v330_v1  ;;  %1729 = vmatpush.bf16.msra.mxu3 %v330_v1  ;;  %s1725_s22 = sshll.u32 %s3438_s19, 8  ;;  %462 = vst.msk [vmem:[#allocation2] sm:$0x1] %vm461_vm2, %v1777_v50  ;;  %v1951_v55 = vld [vmem:[%s3190_s4] ss:$0 sm:$0xff]  ;;  %s1778_s26 = smov 4  }
   0xf   : > { %s1828_s25 = scalar_lea.vmem %s3186_s0, %s1725_s22  ;;  %463 = vst.msk [vmem:[#allocation2 + $0x18] sm:$0x1] %vm461_vm2, %v1777_v50  ;;  %s3009_s28 = scalar_lea.vmem %s3191_s5, %s1725_s22  ;;  %vm1610_vm4 = vcmask 64512  }
  0x10   : > { %v226_v2 = vld [vmem:[%s1828_s25] sm:$0xff]  ;;  %v227_v3 = vld [vmem:[%s1828_s25 + $0x8] sm:$0xff]  ;;  %v228_v14 = vld [vmem:[%s1828_s25 + $0x10] sm:$0xff]  ;;  %464 = vst.msk [vmem:[#allocation2 + $0x30] sm:$0x1] %vm461_vm2, %v1777_v50 }
  0x11   : > { %v234_v4 = vld [vmem:[%s1828_s25 + $0x40] sm:$0xff]  ;;  %v258_v5 = vpack.c.bf16 %v227_v3, %v226_v2  ;;  %v235_v6 = vld [vmem:[%s1828_s25 + $0x48] sm:$0xff]  ;;  %v229_v15 = vld [vmem:[%s1828_s25 + $0x18] sm:$0xff]  ;;  %458 = vst.msk [vmem:[#allocation2 + $0x198] sm:$0xff] %vm279_vm1, %v1777_v50 }
  0x12   : > { %v242_v7 = vld [vmem:[%s1828_s25 + $0x80] sm:$0xff]  ;;  %v243_v8 = vld [vmem:[%s1828_s25 + $0x88] sm:$0xff]  ;;  %v262_v9 = vpack.c.bf16 %v235_v6, %v234_v4  ;;  %v236_v16 = vld [vmem:[%s1828_s25 + $0x50] sm:$0xff]  ;;  %v259_v22 = vpack.c.bf16 %v229_v15, %v228_v14  ;;  %459 = vst.msk [vmem:[#allocation2 + $0x1a0] sm:$0xff] %vm279_vm1, %v1777_v50 }
  0x13   : > { %v266_v10 = vpack.c.bf16 %v243_v8, %v242_v7  ;;  %v250_v11 = vld [vmem:[%s1828_s25 + $0xc0] sm:$0xff]  ;;  %v251_v12 = vld [vmem:[%s1828_s25 + $0xc8] sm:$0xff]  ;;  %1707 = vmatmul.msk.bf16.vlgmr.msra.gmra.mxu0 %vm279_vm1, %v258_v5  ;;  %v237_v17 = vld [vmem:[%s1828_s25 + $0x58] sm:$0xff]  ;;  %465 = vst.msk [vmem:[#allocation2 + $0x48] sm:$0x1] %vm461_vm2, %v1777_v50 }
  0x14   : > { %v270_v13 = vpack.c.bf16 %v251_v12, %v250_v11  ;;  %1711 = vmatmul.msk.bf16.vlgmr.msra.gmra.mxu1 %vm279_vm1, %v262_v9  ;;  %v244_v18 = vld [vmem:[%s1828_s25 + $0x90] sm:$0xff]  ;;  %v245_v19 = vld [vmem:[%s1828_s25 + $0x98] sm:$0xff]  ;;  %v263_v23 = vpack.c.bf16 %v237_v17, %v236_v16  ;;  %v230_v26 = vld [vmem:[%s1828_s25 + $0x20] sm:$0xff]  ;;  %466 = vst.msk [vmem:[#allocation2 + $0x60] sm:$0x1] %vm461_vm2, %v1777_v50 }
  0x15   : > { %1715 = vmatmul.msk.bf16.vlgmr.msra.gmra.mxu2 %vm279_vm1, %v266_v10  ;;  %v252_v20 = vld [vmem:[%s1828_s25 + $0xd0] sm:$0xff]  ;;  %v253_v21 = vld [vmem:[%s1828_s25 + $0xd8] sm:$0xff]  ;;  %v267_v24 = vpack.c.bf16 %v245_v19, %v244_v18  ;;  %v231_v27 = vld [vmem:[%s1828_s25 + $0x28] sm:$0xff]  ;;  %467 = vst.msk [vmem:[#allocation2 + $0x78] sm:$0x1] %vm461_vm2, %v1777_v50 }
  0x16   : > { %1719 = vmatmul.msk.bf16.vlgmr.msra.gmra.mxu3 %vm279_vm1, %v270_v13  ;;  %v271_v25 = vpack.c.bf16 %v253_v21, %v252_v20  ;;  %v238_v28 = vld [vmem:[%s1828_s25 + $0x60] sm:$0xff]  ;;  %v239_v29 = vld [vmem:[%s1828_s25 + $0x68] sm:$0xff]  ;;  %v260_v34 = vpack.c.bf16 %v231_v27, %v230_v26  ;;  %v232_v38 = vld [vmem:[%s1828_s25 + $0x30] sm:$0xff]  ;;  %468 = vst.msk [vmem:[#allocation2 + $0x90] sm:$0x1] %vm461_vm2, %v1777_v50 }
  0x17   : > { %v246_v30 = vld [vmem:[%s1828_s25 + $0xa0] sm:$0xff]  ;;  %v247_v31 = vld [vmem:[%s1828_s25 + $0xa8] sm:$0xff]  ;;  %v264_v35 = vpack.c.bf16 %v239_v29, %v238_v28  ;;  %v233_v39 = vld [vmem:[%s1828_s25 + $0x38] sm:$0xff]  ;;  %469 = vst.msk [vmem:[#allocation2 + $0xa8] sm:$0x1] %vm461_vm2, %v1777_v50 }
  0x18   : > { %v254_v32 = vld [vmem:[%s1828_s25 + $0xe0] sm:$0xff]  ;;  %v255_v33 = vld [vmem:[%s1828_s25 + $0xe8] sm:$0xff]  ;;  %v268_v36 = vpack.c.bf16 %v247_v31, %v246_v30  ;;  %v240_v40 = vld [vmem:[%s1828_s25 + $0x70] sm:$0xff]  ;;  %v261_v46 = vpack.c.bf16 %v233_v39, %v232_v38  ;;  %470 = vst.msk [vmem:[#allocation2 + $0xc0] sm:$0x1] %vm461_vm2, %v1777_v50 }
  0x19   : > { %v272_v37 = vpack.c.bf16 %v255_v33, %v254_v32  ;;  %v241_v41 = vld [vmem:[%s1828_s25 + $0x78] sm:$0xff]  ;;  %v248_v42 = vld [vmem:[%s1828_s25 + $0xb0] sm:$0xff]  ;;  %471 = vst.msk [vmem:[#allocation2 + $0xd8] sm:$0x1] %vm461_vm2, %v1777_v50  ;;  %v535_v53 = vld [vmem:[#allocation2] sm:$0xff] }
  0x1a   : > { %v249_v43 = vld [vmem:[%s1828_s25 + $0xb8] sm:$0xff]  ;;  %v256_v44 = vld [vmem:[%s1828_s25 + $0xf0] sm:$0xff]  ;;  %v265_v47 = vpack.c.bf16 %v241_v41, %v240_v40  ;;  %472 = vst.msk [vmem:[#allocation2 + $0xf0] sm:$0x1] %vm461_vm2, %v1777_v50  ;;  %v569_v56 = vmul.f32 %v1933_v51, %v535_v53  ;;  %v633_v60 = vld [vmem:[#allocation2 + $0x1] sm:$0xff] }
  0x1b   : > { %v257_v45 = vld [vmem:[%s1828_s25 + $0xf8] sm:$0xff]  ;;  %v269_v48 = vpack.c.bf16 %v249_v43, %v248_v42  ;;  %473 = vst.msk [vmem:[#allocation2 + $0x108] sm:$0x1] %vm461_vm2, %v1777_v50  ;;  %v667_v1 = vmul.f32 %v1957_v57, %v633_v60  ;;  %v1980_v2 = vld [vmem:[%s3189_s3 + $0x2] ss:$0 sm:$0xff]  ;;  %v536_v14 = vld [vmem:[#allocation2 + $0x8] sm:$0xff] }
  0x1c   : > { %v273_v49 = vpack.c.bf16 %v257_v45, %v256_v44  ;;  %474 = vst.msk [vmem:[#allocation2 + $0x120] sm:$0x1] %vm461_vm2, %v1777_v50  ;;  %v601_v0 = vadd.f32 %v1951_v55, %v569_v56  ;;  %v731_v3 = vld [vmem:[#allocation2 + $0x2] sm:$0xff] }
  0x1d   : > { %475 = vst.msk [vmem:[#allocation2 + $0x138] sm:$0x1] %vm461_vm2, %v1777_v50  ;;  %v765_v9 = vmul.f32 %v1980_v2, %v731_v3  ;;  %v2007_v13 = vld [vmem:[%s3189_s3 + $0x3] ss:$0 sm:$0xff]  ;;  %v2041_v27 = vld [vmem:[%s3189_s3 + $0x4] ss:$0 sm:$0xff] }
  0x1e   : > { %476 = vst.msk [vmem:[#allocation2 + $0x150] sm:$0x1] %vm461_vm2, %v1777_v50  ;;  %v699_v8 = vadd.f32 %v667_v1, %v601_v0 }
  0x1f   : > { %477 = vst.msk [vmem:[#allocation2 + $0x168] sm:$0x1] %vm461_vm2, %v1777_v50 }
  0x20   : > { %478 = vst.msk [vmem:[#allocation2 + $0x180] sm:$0x1] %vm461_vm2, %v1777_v50  ;;  %v797_v20 = vadd.f32 %v765_v9, %v699_v8 }
  0x21   : > { %481 = vst.msk [vmem:[#allocation2 + $0x29] sm:$0x1] %vm461_vm2, %v1777_v50 }
  0x22   : > { %482 = vst.msk [vmem:[#allocation2 + $0x41] sm:$0x1] %vm461_vm2, %v1777_v50 }
  0x23   : > { %1708 = vmatmul.msk.bf16.gmra.mxu0 %vm279_vm1, %v259_v22  ;;  %483 = vst.msk [vmem:[#allocation2 + $0x59] sm:$0x1] %vm461_vm2, %v1777_v50  ;;  %v570_v22 = vmul.f32 %v1933_v51, %v536_v14 }
  0x24   : > { %1712 = vmatmul.msk.bf16.gmra.mxu1 %vm279_vm1, %v263_v23  ;;  %484 = vst.msk [vmem:[#allocation2 + $0x71] sm:$0x1] %vm461_vm2, %v1777_v50 }
  0x25   : > { %1716 = vmatmul.msk.bf16.gmra.mxu2 %vm279_vm1, %v267_v24  ;;  %485 = vst.msk [vmem:[#allocation2 + $0x89] sm:$0x1] %vm461_vm2, %v1777_v50 }
  0x26   : > { %1720 = vmatmul.msk.bf16.gmra.mxu3 %vm279_vm1, %v271_v25  ;;  %486 = vst.msk [vmem:[#allocation2 + $0xa1] sm:$0x1] %vm461_vm2, %v1777_v50 }
  0x27   : > { %487 = vst.msk [vmem:[#allocation2 + $0xb9] sm:$0x1] %vm461_vm2, %v1777_v50 }
  0x28   : > { %488 = vst.msk [vmem:[#allocation2 + $0xd1] sm:$0x1] %vm461_vm2, %v1777_v50 }
  0x29   : > { %489 = vst.msk [vmem:[#allocation2 + $0xe9] sm:$0x1] %vm461_vm2, %v1777_v50 }
  0x2a   : > { %490 = vst.msk [vmem:[#allocation2 + $0x101] sm:$0x1] %vm461_vm2, %v1777_v50 }
  0x2b   : > { %491 = vst.msk [vmem:[#allocation2 + $0x119] sm:$0x1] %vm461_vm2, %v1777_v50 }
  0x2c   : > { %492 = vst.msk [vmem:[#allocation2 + $0x131] sm:$0x1] %vm461_vm2, %v1777_v50 }
  0x2d   : > { %493 = vst.msk [vmem:[#allocation2 + $0x149] sm:$0x1] %vm461_vm2, %v1777_v50 }
  0x2e   : > { %494 = vst.msk [vmem:[#allocation2 + $0x161] sm:$0x1] %vm461_vm2, %v1777_v50 }
  0x2f   : > { %495 = vst.msk [vmem:[#allocation2 + $0x179] sm:$0x1] %vm461_vm2, %v1777_v50 }
  0x30   : > { %496 = vst.msk [vmem:[#allocation2 + $0x191] sm:$0x1] %vm461_vm2, %v1777_v50 }
  0x31   : > { %479 = vst.msk [vmem:[#allocation2 + $0x198] sm:$0x1] %vm461_vm2, %v1777_v50 }
  0x32   : > { %456 = vst.msk [vmem:[#allocation2 + $0x10] sm:$0x3] %vm455_vm3, %v1777_v50 }
  0x33   : > { %1709 = vmatmul.msk.bf16.gmra.mxu0 %vm279_vm1, %v260_v34  ;;  %480 = vst.msk [vmem:[#allocation2 + $0x11] sm:$0x1] %vm461_vm2, %v1777_v50 }
  0x34   : > { %1713 = vmatmul.msk.bf16.gmra.mxu1 %vm279_vm1, %v264_v35  ;;  %v602_v35 = vadd.f32 %v1951_v55, %v570_v22  ;;  %460 = vst.msk [vmem:[#allocation2 + $0x1a8] sm:$0x3] %vm455_vm3, %v1777_v50 }
  0x35   : > { %1717 = vmatmul.msk.bf16.gmra.mxu2 %vm279_vm1, %v268_v36  ;;  %497 = vst.msk [vmem:[#allocation2 + $0x1a9] sm:$0x1] %vm461_vm2, %v1777_v50  ;;  %v2077_v50 = vld [vmem:[%s3189_s3 + $0x5] ss:$0 sm:$0xff] }
  0x36   : > { %1721 = vmatmul.msk.bf16.gmra.mxu3 %vm279_vm1, %v272_v37 }
  0x39   : > { %v634_v40 = vld [vmem:[#allocation2 + $0x9] sm:$0xff] }
  0x43   : > { %1710 = vmatmul.msk.bf16.gmra.mxu0 %vm279_vm1, %v261_v46  ;;  %v668_v46 = vmul.f32 %v1957_v57, %v634_v40 }
  0x44   : > { %1714 = vmatmul.msk.bf16.gmra.mxu1 %vm279_vm1, %v265_v47  ;;  %v732_v47 = vld [vmem:[#allocation2 + $0xa] sm:$0xff] }
  0x45   : > { %1718 = vmatmul.msk.bf16.gmra.mxu2 %vm279_vm1, %v269_v48  ;;  %v766_v53 = vmul.f32 %v1980_v2, %v732_v47  ;;  %v700_v1 = vadd.f32 %v668_v46, %v602_v35 }
  0x46   : > { %1722 = vmatmul.msk.bf16.gmra.mxu3 %vm279_vm1, %v273_v49 }
  0x90   : > { %v341_v54 = vpop.f32.mrf.mxu0 }
  0x91   : > { %v1962_v58 = vadd.f32 %v1940_v52, %v341_v54  ;;  %v361_v59 = vpop.f32.mrf.mxu1 }
  0x92   : > { %v1967_v61 = vadd.f32 %v1940_v52, %v361_v59 }
  0x93   : > { %3288 = vst [vmem:[#allocation3_spill] sm:$0xff] %v1962_v58  ;;  %v3204_v62 = vmax.f32 %v1962_v58, 0.0 }
  0x94   : > { %3289 = vst [vmem:[#allocation4_spill] sm:$0xff] %v1967_v61  ;;  %v3197_v63 = vmax.f32 %v1967_v61, 0.0 }
  0x95   : > { %499 = vst.msk [vmem:[#allocation2 + $0x19] sm:$0xff] %vm279_vm1, %v3204_v62 }
  0x96   : > { %507 = vst.msk [vmem:[#allocation2 + $0x79] sm:$0xff] %vm279_vm1, %v3197_v63 }
  0x98   : > { %v381_v4 = vpop.f32.mrf.mxu2  ;;  %v343_v7 = vpop.f32.mrf.mxu0 }
  0x99   : > { %v1993_v5 = vadd.f32 %v1940_v52, %v381_v4  ;;  %v401_v6 = vpop.f32.mrf.mxu3  ;;  %v2002_v11 = vadd.f32 %v1940_v52, %v343_v7  ;;  %v363_v12 = vpop.f32.mrf.mxu1 }
  0x9a   : > { %v1999_v10 = vadd.f32 %v1940_v52, %v401_v6  ;;  %v2013_v16 = vadd.f32 %v1940_v52, %v363_v12 }
  0x9b   : > { %3290 = vst [vmem:[#allocation5_spill] sm:$0xff] %v1993_v5  ;;  %v3194_v15 = vmax.f32 %v1993_v5, 0.0  ;;  %v3202_v18 = vmax.f32 %v2002_v11, 0.0 }
  0x9c   : > { %3291 = vst [vmem:[#allocation6_spill] sm:$0xff] %v1999_v10  ;;  %v3193_v17 = vmax.f32 %v1999_v10, 0.0  ;;  %v3195_v19 = vmax.f32 %v2013_v16, 0.0  ;;  %v829_v21 = vld [vmem:[#allocation2 + $0x18] sm:$0xff] }
  0x9d   : > { %3292 = vst [vmem:[#allocation7_spill] sm:$0xff] %v2002_v11  ;;  %v863_v23 = vmul.f32 %v2007_v13, %v829_v21  ;;  %v571_v24 = vmul.f32 %v1933_v51, %v829_v21  ;;  %v2031_v25 = vld [vmem:[#allocation2 + $0x78] sm:$0xff]  ;;  %v798_v21 = vadd.f32 %v766_v53, %v700_v1 }
  0x9e   : > { %3293 = vst [vmem:[#allocation8_spill] sm:$0xff] %v2013_v16  ;;  %v2033_v26 = vld [vmem:[#allocation2 + $0x79] sm:$0xff]  ;;  %v579_v28 = vmul.f32 %v1933_v51, %v2031_v25 }
  0x9f   : > { %515 = vst.msk [vmem:[#allocation2 + $0xd9] sm:$0xff] %vm279_vm1, %v3194_v15  ;;  %v927_v30 = vld [vmem:[#allocation2 + $0x19] sm:$0xff]  ;;  %v895_v34 = vadd.f32 %v863_v23, %v797_v20  ;;  %v677_v36 = vmul.f32 %v1957_v57, %v2033_v26  ;;  %v603_v41 = vadd.f32 %v1951_v55, %v571_v24 }
  0xa0   : > { %523 = vst.msk [vmem:[#allocation2 + $0x139] sm:$0xff] %vm279_vm1, %v3193_v17  ;;  %v383_v29 = vpop.f32.mrf.mxu2  ;;  %v346_v33 = vpop.f32.mrf.mxu0  ;;  %v611_v42 = vadd.f32 %v1951_v55, %v579_v28  ;;  %v961_v45 = vmul.f32 %v2041_v27, %v927_v30  ;;  %v669_v54 = vmul.f32 %v1957_v57, %v927_v30 }
  0xa1   : > { %500 = vst.msk [vmem:[#allocation2 + $0x21] sm:$0xff] %vm279_vm1, %v3202_v18  ;;  %v2049_v31 = vadd.f32 %v1940_v52, %v383_v29  ;;  %v403_v32 = vpop.f32.mrf.mxu3  ;;  %v2060_v38 = vadd.f32 %v1940_v52, %v346_v33  ;;  %v366_v39 = vpop.f32.mrf.mxu1 }
  0xa2   : > { %508 = vst.msk [vmem:[#allocation2 + $0x81] sm:$0xff] %vm279_vm1, %v3195_v19  ;;  %v2057_v37 = vadd.f32 %v1940_v52, %v403_v32  ;;  %v2068_v44 = vadd.f32 %v1940_v52, %v366_v39  ;;  %v993_v0 = vadd.f32 %v961_v45, %v895_v34  ;;  %v701_v9 = vadd.f32 %v669_v54, %v603_v41 }
  0xa3   : > { %3294 = vst [vmem:[#allocation9_spill] sm:$0xff] %v2049_v31  ;;  %v3196_v43 = vmax.f32 %v2049_v31, 0.0  ;;  %v3201_v49 = vmax.f32 %v2060_v38, 0.0  ;;  %v709_v20 = vadd.f32 %v677_v36, %v611_v42 }
  0xa4   : > { %3295 = vst [vmem:[#allocation10_spill] sm:$0xff] %v2057_v37  ;;  %v3192_v48 = vmax.f32 %v2057_v37, 0.0  ;;  %v3199_v60 = vmax.f32 %v2068_v44, 0.0 }
  0xa5   : > { %3296 = vst [vmem:[#allocation11_spill] sm:$0xff] %v2060_v38 }
  0xa6   : > { %3297 = vst [vmem:[#allocation12_spill] sm:$0xff] %v2068_v44  ;;  %v2081_v56 = vld [vmem:[#allocation2 + $0xd8] sm:$0xff] }
  0xa7   : > { %3298 = vst [vmem:[#allocation13_spill] sm:$0xff] %v2081_v56  ;;  %v2083_v59 = vld [vmem:[#allocation2 + $0xd9] sm:$0xff]  ;;  %v587_v12 = vmul.f32 %v1933_v51, %v2081_v56 }
  0xa8   : > { %3299 = vst [vmem:[#allocation14_spill] sm:$0xff] %v2083_v59  ;;  %v561_v3 = vld [vmem:[#allocation2 + $0x138] sm:$0xff]  ;;  %v2092_v7 = vld [vmem:[#allocation2 + $0x20] sm:$0xff]  ;;  %v685_v14 = vmul.f32 %v1957_v57, %v2083_v59  ;;  %v386_v32 = vpop.f32.mrf.mxu2  ;;  %v348_v42 = vpop.f32.mrf.mxu0 }
  0xa9   : > { %516 = vst.msk [vmem:[#allocation2 + $0xe1] sm:$0xff] %vm279_vm1, %v3196_v43  ;;  %v659_v4 = vld [vmem:[#allocation2 + $0x139] sm:$0xff]  ;;  %v2094_v8 = vld [vmem:[#allocation2 + $0x21] sm:$0xff]  ;;  %v864_v22 = vmul.f32 %v2007_v13, %v2092_v7  ;;  %v595_v29 = vmul.f32 %v1933_v51, %v561_v3  ;;  %v2119_v40 = vadd.f32 %v1940_v52, %v386_v32  ;;  %v406_v41 = vpop.f32.mrf.mxu3  ;;  %v2129_v1 = vadd.f32 %v1940_v52, %v348_v42  ;;  %v368_v3 = vpop.f32.mrf.mxu1 }
  0xaa   : > { %524 = vst.msk [vmem:[#allocation2 + $0x141] sm:$0xff] %vm279_vm1, %v3192_v48  ;;  %v1025_v6 = vld [vmem:[#allocation2 + $0x1a] sm:$0xff]  ;;  %v2105_v23 = vld [vmem:[#allocation2 + $0x22] sm:$0xff]  ;;  %v693_v30 = vmul.f32 %v1957_v57, %v659_v4  ;;  %v962_v34 = vmul.f32 %v2041_v27, %v2094_v8  ;;  %v2126_v54 = vadd.f32 %v1940_v52, %v406_v41 }
  0xab   : > { %501 = vst.msk [vmem:[#allocation2 + $0x31] sm:$0xff] %vm279_vm1, %v3201_v49  ;;  %v546_v24 = vld [vmem:[#allocation2 + $0x80] sm:$0xff]  ;;  %v1059_v33 = vmul.f32 %v2077_v50, %v1025_v6  ;;  %v1060_v35 = vmul.f32 %v2077_v50, %v2105_v23  ;;  %v896_v45 = vadd.f32 %v864_v22, %v798_v21  ;;  %v767_v46 = vmul.f32 %v1980_v2, %v1025_v6 }
  0xac   : > { %v644_v28 = vld [vmem:[#allocation2 + $0x81] sm:$0xff]  ;;  %509 = vst.msk [vmem:[#allocation2 + $0x91] sm:$0xff] %vm279_vm1, %v3199_v60  ;;  %v580_v36 = vmul.f32 %v1933_v51, %v546_v24  ;;  %v3200_v32 = vmax.f32 %v2119_v40, 0.0  ;;  %v2135_v21 = vadd.f32 %v1940_v52, %v368_v3  ;;  %v619_v22 = vadd.f32 %v1951_v55, %v587_v12 }
  0xad   : > { %v742_v39 = vld [vmem:[#allocation2 + $0x82] sm:$0xff]  ;;  %3300 = vst [vmem:[#allocation15_spill] sm:$0xff] %v2119_v40  ;;  %v678_v47 = vmul.f32 %v1957_v57, %v644_v28  ;;  %v2123_v53 = vld [vmem:[#allocation2 + $0x7a] sm:$0xff]  ;;  %v994_v6 = vadd.f32 %v962_v34, %v896_v45  ;;  %v3203_v28 = vmax.f32 %v2126_v54, 0.0  ;;  %v3198_v41 = vmax.f32 %v2129_v1, 0.0 }
  0xae   : > { %3301 = vst [vmem:[#allocation16_spill] sm:$0xff] %v2123_v53  ;;  %v612_v4 = vadd.f32 %v1951_v55, %v580_v36  ;;  %v776_v24 = vmul.f32 %v1980_v2, %v742_v39  ;;  %v2143_v42 = vld [vmem:[%s3189_s3 + $0x6] ss:$0 sm:$0xff]  ;;  %v775_v39 = vmul.f32 %v1980_v2, %v2123_v53  ;;  %v3205_v12 = vmax.f32 %v2135_v21, 0.0  ;;  %v2156_v45 = vld [vmem:[%s3189_s3 + $0x7] ss:$0 sm:$0xff] }
  0xaf   : > { %3302 = vst [vmem:[#allocation17_spill] sm:$0xff] %v2126_v54  ;;  %v1091_v34 = vadd.f32 %v1059_v33, %v993_v0  ;;  %v2158_v3 = vadd.f32 %v1060_v35, %v994_v6  ;;  %v717_v0 = vadd.f32 %v685_v14, %v619_v22  ;;  %v627_v43 = vadd.f32 %v1951_v55, %v595_v29 }
  0xb0   : > { %3303 = vst [vmem:[#allocation18_spill] sm:$0xff] %v2129_v1  ;;  %v710_v36 = vadd.f32 %v678_v47, %v612_v4  ;;  %v2145_v48 = vld [vmem:[#allocation2 + $0xda] sm:$0xff]  ;;  %v799_v47 = vadd.f32 %v767_v46, %v701_v9  ;;  %v807_v6 = vadd.f32 %v775_v39, %v709_v20  ;;  %v388_v29 = vpop.f32.mrf.mxu2 }
  0xb1   : > { %3304 = vst [vmem:[#allocation19_spill] sm:$0xff] %v2135_v21  ;;  %v757_v4 = vld [vmem:[#allocation2 + $0x13a] sm:$0xff]  ;;  %v783_v33 = vmul.f32 %v1980_v2, %v2145_v48  ;;  %v725_v39 = vadd.f32 %v693_v30, %v627_v43  ;;  %v408_v60 = vpop.f32.mrf.mxu3 }
  0xb2   : > { %3305 = vst [vmem:[#allocation20_spill] sm:$0xff] %v2145_v48  ;;  %v2163_v17 = vld [vmem:[#allocation2 + $0x30] sm:$0xff]  ;;  %v2167_v19 = vadd.f32 %v776_v24, %v710_v36  ;;  %v562_v35 = vld [vmem:[#allocation2 + $0x140] sm:$0xff]  ;;  %v791_v22 = vmul.f32 %v1980_v2, %v757_v4  ;;  %v351_v4 = vpop.f32.mrf.mxu0 }
  0xb3   : > { %517 = vst.msk [vmem:[#allocation2 + $0xf1] sm:$0xff] %vm279_vm1, %v3200_v32  ;;  %v2165_v15 = vld [vmem:[#allocation2 + $0x31] sm:$0xff]  ;;  %v1158_v9 = vmul.f32 %v2143_v42, %v2163_v17  ;;  %v865_v46 = vmul.f32 %v2007_v13, %v2163_v17  ;;  %v596_v18 = vmul.f32 %v1933_v51, %v562_v35  ;;  %v2201_v62 = vadd.f32 %v1940_v52, %v351_v4  ;;  %v660_v35 = vld [vmem:[#allocation2 + $0x141] sm:$0xff] }
  0xb4   : > { %525 = vst.msk [vmem:[#allocation2 + $0x151] sm:$0xff] %vm279_vm1, %v3203_v28  ;;  %v2179_v24 = vld [vmem:[#allocation2 + $0x90] sm:$0xff]  ;;  %v1256_v36 = vmul.f32 %v2156_v45, %v2165_v15  ;;  %v2198_v28 = vadd.f32 %v1940_v52, %v408_v60  ;;  %v963_v37 = vmul.f32 %v2041_v27, %v2165_v15 }
  0xb5   : > { %502 = vst.msk [vmem:[#allocation2 + $0x39] sm:$0xff] %vm279_vm1, %v3198_v41  ;;  %v2181_v14 = vld [vmem:[#allocation2 + $0x91] sm:$0xff]  ;;  %v873_v63 = vmul.f32 %v2007_v13, %v2179_v24  ;;  %v2194_v41 = vadd.f32 %v1940_v52, %v388_v29  ;;  %v1190_v32 = vadd.f32 %v1158_v9, %v1091_v34  ;;  %v897_v49 = vadd.f32 %v865_v46, %v799_v47 }
  0xb6   : > { %510 = vst.msk [vmem:[#allocation2 + $0x99] sm:$0xff] %vm279_vm1, %v3205_v12  ;;  %v971_v20 = vmul.f32 %v2041_v27, %v2181_v14  ;;  %v371_v12 = vpop.f32.mrf.mxu1  ;;  %v815_v34 = vadd.f32 %v783_v33, %v717_v0  ;;  %v2209_v47 = vadd.f32 %v791_v22, %v725_v39  ;;  %v3210_v60 = vmax.f32 %v2198_v28, 0.0  ;;  %v2224_v0 = vld [vmem:[%s3189_s3 + $0x8] ss:$0 sm:$0xff] }
  0xb7   : > { %3306 = vst [vmem:[#allocation21_spill] sm:$0xff] %v2194_v41  ;;  %v905_v43 = vadd.f32 %v873_v63, %v807_v6  ;;  %v3209_v30 = vmax.f32 %v2194_v41, 0.0  ;;  %v2207_v29 = vadd.f32 %v1940_v52, %v371_v12  ;;  %v3215_v9 = vmax.f32 %v2201_v62, 0.0  ;;  %v758_v63 = vld [vmem:[#allocation2 + $0x142] sm:$0xff] }
  0xb8   : > { %3307 = vst [vmem:[#allocation22_spill] sm:$0xff] %v2198_v28  ;;  %v1288_v46 = vadd.f32 %v1256_v36, %v1190_v32  ;;  %v995_v4 = vadd.f32 %v963_v37, %v897_v49  ;;  %v628_v6 = vadd.f32 %v1951_v55, %v596_v18  ;;  %v694_v18 = vmul.f32 %v1957_v57, %v660_v35  ;;  %v391_v1 = vpop.f32.mrf.mxu2 }
  0xb9   : > { %3308 = vst [vmem:[#allocation23_spill] sm:$0xff] %v2201_v62  ;;  %v2228_v37 = vadd.f32 %v971_v20, %v905_v43  ;;  %v2267_v41 = vmul.f32 %v1980_v2, %v758_v63  ;;  %v2271_v35 = vmul.f32 %v1933_v51, %v2092_v7  ;;  %v2285_v7 = vadd.f32 %v1940_v52, %v391_v1  ;;  %v411_v62 = vpop.f32.mrf.mxu3 }
  0xba   : > { %3309 = vst [vmem:[#allocation24_spill] sm:$0xff] %v2207_v29  ;;  %v2213_v10 = vld [vmem:[#allocation2 + $0xf0] sm:$0xff]  ;;  %v2291_v54 = vadd.f32 %v1940_v52, %v411_v62 }
  0xbb   : > { %3310 = vst [vmem:[#allocation25_spill] sm:$0xff] %v2213_v10  ;;  %v2215_v5 = vld [vmem:[#allocation2 + $0xf1] sm:$0xff]  ;;  %v881_v32 = vmul.f32 %v2007_v13, %v2213_v10 }
  0xbc   : > { %3311 = vst [vmem:[#allocation26_spill] sm:$0xff] %v2215_v5  ;;  %v2230_v49 = vld [vmem:[#allocation2 + $0x150] sm:$0xff]  ;;  %v2240_v36 = vld [vmem:[#allocation2 + $0x38] sm:$0xff]  ;;  %v979_v20 = vmul.f32 %v2041_v27, %v2215_v5  ;;  %v3233_v62 = vmax.f32 %v2291_v54, 0.0 }
  0xbd   : > { %518 = vst.msk [vmem:[#allocation2 + $0xf9] sm:$0xff] %vm279_vm1, %v3209_v30  ;;  %v2232_v33 = vld [vmem:[#allocation2 + $0x151] sm:$0xff]  ;;  %v2242_v39 = vld [vmem:[#allocation2 + $0x39] sm:$0xff]  ;;  %v889_v43 = vmul.f32 %v2007_v13, %v2230_v49  ;;  %v1159_v12 = vmul.f32 %v2143_v42, %v2240_v36  ;;  %v913_v1 = vadd.f32 %v881_v32, %v815_v34  ;;  %v726_v32 = vadd.f32 %v694_v18, %v628_v6 }
  0xbe   : > { %3312 = vst [vmem:[#allocation27_spill] sm:$0xff] %v2230_v49  ;;  %v2238_v22 = vld [vmem:[#allocation2 + $0x32] sm:$0xff]  ;;  %v2250_v30 = vmul.f32 %v2041_v27, %v2232_v33  ;;  %v2260_v16 = vld [vmem:[#allocation2 + $0x3a] sm:$0xff]  ;;  %v1257_v28 = vmul.f32 %v2156_v45, %v2242_v39  ;;  %v373_v21 = vpop.f32.mrf.mxu1 }
  0xbf   : > { %3313 = vst [vmem:[#allocation28_spill] sm:$0xff] %v2232_v33  ;;  %v2262_v31 = vld [vmem:[#allocation2 + $0x98] sm:$0xff]  ;;  %v1355_v44 = vmul.f32 %v2224_v0, %v2260_v16  ;;  %v1061_v40 = vmul.f32 %v2077_v50, %v2238_v22  ;;  %v1011_v34 = vadd.f32 %v979_v20, %v913_v1 }
  0xc0   : > { %526 = vst.msk [vmem:[#allocation2 + $0x159] sm:$0xff] %vm279_vm1, %v3210_v60  ;;  %v1354_v60 = vmul.f32 %v2224_v0, %v2238_v22  ;;  %v2264_v61 = vld [vmem:[#allocation2 + $0x99] sm:$0xff]  ;;  %v874_v63 = vmul.f32 %v2007_v13, %v2262_v31 }
  0xc1   : > { %503 = vst.msk [vmem:[#allocation2 + $0x49] sm:$0xff] %vm279_vm1, %v3215_v9  ;;  %v3314_v9 = vmax.f32 %v2207_v29, 0.0  ;;  %v353_v29 = vpop.f32.mrf.mxu0  ;;  %v972_v11 = vmul.f32 %v2041_v27, %v2264_v61  ;;  %v2297_v10 = vld [vmem:[#allocation2 + $0x9a] sm:$0xff]  ;;  %v2299_v33 = vld [vmem:[#allocation2 + $0x92] sm:$0xff]  ;;  %v1093_v49 = vadd.f32 %v1061_v40, %v995_v4  ;;  %v921_v4 = vadd.f32 %v889_v43, %v2209_v47  ;;  %v393_v47 = vpop.f32.mrf.mxu2 }
  0xc2   : > { %3315 = vst [vmem:[#allocation29_spill] sm:$0xff] %v2285_v7  ;;  %v1386_v38 = vadd.f32 %v1354_v60, %v1288_v46  ;;  %v2294_v58 = vadd.f32 %v1940_v52, %v353_v29  ;;  %v906_v5 = vadd.f32 %v874_v63, %v2167_v19  ;;  %v3234_v60 = vmax.f32 %v2285_v7, 0.0 }
  0xc3   : > { %511 = vst.msk [vmem:[#allocation2 + $0xa9] sm:$0xff] %vm279_vm1, %v3314_v9  ;;  %v1191_v9 = vadd.f32 %v1159_v12, %v2158_v3  ;;  %v2303_v3 = vadd.f32 %v1940_v52, %v373_v21 }
  0xc4   : > { %3316 = vst [vmem:[#allocation30_spill] sm:$0xff] %v2291_v54  ;;  %v1418_v46 = vmax.f32 %v1386_v38, 0.0  ;;  %v3235_v29 = vmax.f32 %v2294_v58, 0.0  ;;  %v1004_v48 = vadd.f32 %v972_v11, %v906_v5  ;;  %v2307_v59 = vld [vmem:[#allocation2 + $0xf2] sm:$0xff]  ;;  %v1070_v38 = vmul.f32 %v2077_v50, %v2297_v10 }
  0xc5   : > { %3317 = vst [vmem:[#allocation31_spill] sm:$0xff] %v2294_v58  ;;  %v1289_v12 = vadd.f32 %v1257_v28, %v1191_v9  ;;  %v3236_v19 = vmax.f32 %v2303_v3, 0.0  ;;  %v1069_v28 = vmul.f32 %v2077_v50, %v2299_v33 }
  0xc6   : > { %3318 = vst [vmem:[#allocation32_spill] sm:$0xff] %v2299_v33  ;;  %1482 = vrot.lane.b32.xlu0 %v1418_v46, %s1778_s26 }
  0xc7   : > { %3319 = vst [vmem:[#allocation33_spill] sm:$0xff] %v2303_v3  ;;  %v1387_v21 = vadd.f32 %v1355_v44, %v1289_v12  ;;  %v2318_v40 = vld [vmem:[#allocation2 + $0x152] sm:$0xff]  ;;  %v1077_v44 = vmul.f32 %v2077_v50, %v2307_v59  ;;  %v2335_v12 = vadd.f32 %v1070_v38, %v1004_v48  ;;  %v1101_v43 = vadd.f32 %v1069_v28, %v2228_v37  ;;  %v413_v38 = vpop.f32.mrf.mxu3  ;;  %v376_v28 = vpop.f32.mrf.mxu1 }
  0xc8   : > { %3320 = vst [vmem:[#allocation34_spill] sm:$0xff] %v2307_v59  ;;  %v2323_v5 = vld [vmem:[#allocation2 + $0x48] sm:$0xff]  ;;  %v856_v63 = vld [vmem:[#allocation2 + $0x158] sm:$0xff]  ;;  %v1085_v1 = vmul.f32 %v2077_v50, %v2318_v40  ;;  %v2359_v7 = vadd.f32 %v1940_v52, %v413_v38  ;;  %v1019_v59 = vadd.f32 %v2250_v30, %v921_v4 }
  0xc9   : > { %519 = vst.msk [vmem:[#allocation2 + $0x109] sm:$0xff] %vm279_vm1, %v3234_v60  ;;  %v2325_v11 = vld [vmem:[#allocation2 + $0x49] sm:$0xff]  ;;  %v1419_v9 = vmax.f32 %v1387_v21, 0.0  ;;  %v1160_v46 = vmul.f32 %v2143_v42, %v2323_v5  ;;  %v2354_v21 = vadd.f32 %v1940_v52, %v393_v47  ;;  %v356_v60 = vpop.f32.mrf.mxu0  ;;  %v890_v54 = vmul.f32 %v2007_v13, %v856_v63  ;;  %v954_v3 = vld [vmem:[#allocation2 + $0x159] sm:$0xff] }
  0xca   : > { %3321 = vst [vmem:[#allocation35_spill] sm:$0xff] %v2318_v40  ;;  %v2339_v20 = vld [vmem:[#allocation2 + $0xa9] sm:$0xff]  ;;  %v1258_v6 = vmul.f32 %v2156_v45, %v2325_v11  ;;  %v2362_v37 = vadd.f32 %v1940_v52, %v356_v60  ;;  %v2367_v40 = vadd.f32 %v1940_v52, %v376_v28  ;;  %v3244_v63 = vmax.f32 %v2359_v7, 0.0 }
  0xcb   : > { %527 = vst.msk [vmem:[#allocation2 + $0x169] sm:$0xff] %vm279_vm1, %v3233_v62  ;;  %v2337_v62 = vld [vmem:[#allocation2 + $0xa8] sm:$0xff]  ;;  %v1266_v18 = vmul.f32 %v2156_v45, %v2339_v20  ;;  %v3245_v47 = vmax.f32 %v2354_v21, 0.0  ;;  %v1117_v56 = vadd.f32 %v1085_v1, %v1019_v59 }
  0xcc   : > { %504 = vst.msk [vmem:[#allocation2 + $0x51] sm:$0xff] %vm279_vm1, %v3235_v29  ;;  %v1168_v48 = vmul.f32 %v2143_v42, %v2337_v62  ;;  %v1192_v29 = vadd.f32 %v1160_v46, %v1093_v49  ;;  %v1109_v49 = vadd.f32 %v1077_v44, %v1011_v34  ;;  %v3246_v46 = vmax.f32 %v2362_v37, 0.0 }
  0xcd   : > { %512 = vst.msk [vmem:[#allocation2 + $0xb1] sm:$0xff] %vm279_vm1, %v3236_v19  ;;  %v824_v19 = vadd.f32 %v2267_v41, %v726_v32  ;;  %v1052_v32 = vld [vmem:[#allocation2 + $0x15a] sm:$0xff]  ;;  %v3249_v30 = vmax.f32 %v2367_v40, 0.0 }
  0xce   : > { %3322 = vst [vmem:[#allocation36_spill] sm:$0xff] %v2354_v21  ;;  %v1200_v58 = vadd.f32 %v1168_v48, %v1101_v43  ;;  %v988_v43 = vmul.f32 %v2041_v27, %v954_v3  ;;  %1484 = vrot.lane.b32.xlu0 %v1419_v9, %s1778_s26 }
  0xcf   : > { %3323 = vst [vmem:[#allocation37_spill] sm:$0xff] %v2359_v7  ;;  %v922_v41 = vadd.f32 %v890_v54, %v824_v19  ;;  %v1290_v54 = vadd.f32 %v1258_v6, %v1192_v29 }
  0xd0   : > { %3324 = vst [vmem:[#allocation38_spill] sm:$0xff] %v2362_v37  ;;  %v2371_v38 = vld [vmem:[#allocation2 + $0x108] sm:$0xff]  ;;  %v1298_v34 = vadd.f32 %v1266_v18, %v1200_v58  ;;  %v1086_v58 = vmul.f32 %v2077_v50, %v1052_v32  ;;  %v396_v32 = vpop.f32.mrf.mxu2 }
  0xd1   : > { %3325 = vst [vmem:[#allocation39_spill] sm:$0xff] %v2367_v40  ;;  %v2373_v60 = vld [vmem:[#allocation2 + $0x109] sm:$0xff]  ;;  %v1176_v19 = vmul.f32 %v2143_v42, %v2371_v38 }
  0xd2   : > { %3326 = vst [vmem:[#allocation40_spill] sm:$0xff] %v2371_v38  ;;  %v2383_v44 = vld [vmem:[#allocation2 + $0x168] sm:$0xff]  ;;  %v1274_v3 = vmul.f32 %v2156_v45, %v2373_v60  ;;  %v378_v38 = vpop.f32.mrf.mxu1 }
  0xd3   : > { %3327 = vst [vmem:[#allocation41_spill] sm:$0xff] %v2373_v60  ;;  %v2385_v4 = vld [vmem:[#allocation2 + $0x169] sm:$0xff]  ;;  %v1184_v29 = vmul.f32 %v2143_v42, %v2383_v44  ;;  %v1208_v28 = vadd.f32 %v1176_v19, %v1109_v49  ;;  %v670_v49 = vmul.f32 %v1957_v57, %v2094_v8  ;;  %v358_v19 = vpop.f32.mrf.mxu0 }
  0xd4   : > { %520 = vst.msk [vmem:[#allocation2 + $0x111] sm:$0xff] %vm279_vm1, %v3245_v47  ;;  %v2390_v59 = vld [vmem:[#allocation2 + $0x4a] sm:$0xff]  ;;  %v1282_v9 = vmul.f32 %v2156_v45, %v2385_v4  ;;  %v2408_v18 = vld [vmem:[#allocation2 + $0xb2] sm:$0xff]  ;;  %v604_v47 = vadd.f32 %v1951_v55, %v2271_v35  ;;  %v2426_v35 = vadd.f32 %v1940_v52, %v396_v32  ;;  %v2436_v8 = vadd.f32 %v1940_v52, %v358_v19 }
  0xd5   : > { %3328 = vst [vmem:[#allocation42_spill] sm:$0xff] %v2383_v44  ;;  %v1356_v1 = vmul.f32 %v2224_v0, %v2390_v59  ;;  %v2404_v6 = vld [vmem:[#allocation2 + $0xb0] sm:$0xff]  ;;  %v1365_v37 = vmul.f32 %v2224_v0, %v2408_v18  ;;  %v1216_v32 = vadd.f32 %v1184_v29, %v1117_v56  ;;  %v1306_v44 = vadd.f32 %v1274_v3, %v1208_v28 }
  0xd6   : > { %3329 = vst [vmem:[#allocation43_spill] sm:$0xff] %v2385_v4  ;;  %v2406_v48 = vld [vmem:[#allocation2 + $0xb1] sm:$0xff]  ;;  %v3262_v4 = vmax.f32 %v2426_v35, 0.0 }
  0xd7   : > { %528 = vst.msk [vmem:[#allocation2 + $0x171] sm:$0xff] %vm279_vm1, %v3244_v63  ;;  %v1020_v63 = vadd.f32 %v988_v43, %v922_v41  ;;  %v1267_v7 = vmul.f32 %v2156_v45, %v2406_v48  ;;  %v2419_v21 = vld [vmem:[#allocation2 + $0xaa] sm:$0xff]  ;;  %v768_v41 = vmul.f32 %v1980_v2, %v2105_v23  ;;  %v416_v43 = vpop.f32.mrf.mxu3 }
  0xd8   : > { %505 = vst.msk [vmem:[#allocation2 + $0x61] sm:$0xff] %vm279_vm1, %v3246_v46  ;;  %v1169_v46 = vmul.f32 %v2143_v42, %v2404_v6  ;;  %v1364_v40 = vmul.f32 %v2224_v0, %v2419_v21  ;;  %v2433_v60 = vadd.f32 %v1940_v52, %v416_v43 }
  0xd9   : > { %3330 = vst [vmem:[#allocation44_spill] sm:$0xff] %v2406_v48  ;;  %v3265_v48 = vmax.f32 %v2436_v8, 0.0 }
  0xda   : > { %3331 = vst [vmem:[#allocation45_spill] sm:$0xff] %v2408_v18  ;;  %v1201_v23 = vadd.f32 %v1169_v46, %v2335_v12  ;;  %v3261_v18 = vmax.f32 %v2433_v60, 0.0  ;;  %v1396_v19 = vadd.f32 %v1364_v40, %v1298_v34 }
  0xdb   : > { %513 = vst.msk [vmem:[#allocation2 + $0xc1] sm:$0xff] %vm279_vm1, %v3249_v30  ;;  %v1388_v30 = vadd.f32 %v1356_v1, %v1290_v54  ;;  %v2441_v54 = vadd.f32 %v1940_v52, %v378_v38  ;;  %v2445_v53 = vld [vmem:[#allocation2 + $0x10a] sm:$0xff]  ;;  %v1118_v38 = vadd.f32 %v1086_v58, %v1020_v63 }
  0xdc   : > { %3332 = vst [vmem:[#allocation46_spill] sm:$0xff] %v2426_v35  ;;  %v1299_v43 = vadd.f32 %v1267_v7, %v1201_v23  ;;  %v1372_v12 = vmul.f32 %v2224_v0, %v2445_v53  ;;  %v702_v7 = vadd.f32 %v670_v49, %v604_v47  ;;  %v866_v47 = vmul.f32 %v2007_v13, %v2240_v36 }
  0xdd   : > { %3333 = vst [vmem:[#allocation47_spill] sm:$0xff] %v2433_v60  ;;  %v1420_v1 = vmax.f32 %v1388_v30, 0.0  ;;  %v3266_v56 = vmax.f32 %v2441_v54, 0.0  ;;  %v1071_v60 = vmul.f32 %v2077_v50, %v2419_v21 }
  0xde   : > { %3334 = vst [vmem:[#allocation48_spill] sm:$0xff] %v2436_v8  ;;  %v2454_v46 = vld [vmem:[#allocation2 + $0x16a] sm:$0xff]  ;;  %v1397_v40 = vadd.f32 %v1365_v37, %v1299_v43  ;;  %v1347_v23 = vld [vmem:[#allocation2 + $0x172] sm:$0xff]  ;;  %v1404_v63 = vadd.f32 %v1372_v12, %v1306_v44  ;;  %v800_v58 = vadd.f32 %v768_v41, %v702_v7  ;;  %v398_v37 = vpop.f32.mrf.mxu2  ;;  %v964_v7 = vmul.f32 %v2041_v27, %v2242_v39 }
  0xdf   : > { %3335 = vst [vmem:[#allocation49_spill] sm:$0xff] %v2441_v54  ;;  %1486 = vrot.lane.b32.xlu1 %v1420_v1, %s1778_s26  ;;  %v1151_v30 = vld [vmem:[#allocation2 + $0x170] sm:$0xff]  ;;  %v1380_v34 = vmul.f32 %v2224_v0, %v2454_v46  ;;  %v1314_v1 = vadd.f32 %v1282_v9, %v1216_v32  ;;  %v418_v44 = vpop.f32.mrf.mxu3  ;;  %v1428_v9 = vmax.f32 %v1396_v19, 0.0  ;;  %v573_v19 = vmul.f32 %v1933_v51, %v2163_v17 }
  0xe0   : > { %3336 = vst [vmem:[#allocation50_spill] sm:$0xff] %v2445_v53  ;;  %v1249_v3 = vld [vmem:[#allocation2 + $0x171] sm:$0xff]  ;;  %v1185_v29 = vmul.f32 %v2143_v42, %v1151_v30  ;;  %v1429_v49 = vmax.f32 %v1397_v40, 0.0  ;;  %v1381_v30 = vmul.f32 %v2224_v0, %v1347_v23  ;;  %v1436_v41 = vmax.f32 %v1404_v63, 0.0 }
  0xe1   : > { %521 = vst.msk [vmem:[#allocation2 + $0x121] sm:$0xff] %vm279_vm1, %v3262_v4  ;;  %v1283_v28 = vmul.f32 %v2156_v45, %v1249_v3  ;;  %v2472_v3 = vld [vmem:[#allocation2 + $0x50] sm:$0xff]  ;;  %v898_v12 = vadd.f32 %v866_v47, %v800_v58  ;;  %v2480_v4 = vadd.f32 %v1940_v52, %v418_v44  ;;  %v1412_v32 = vadd.f32 %v1380_v34, %v1314_v1 }
  0xe2   : > { %3337 = vst [vmem:[#allocation51_spill] sm:$0xff] %v2454_v46  ;;  %v1217_v43 = vadd.f32 %v1185_v29, %v1118_v38  ;;  %1504 = vrot.lane.b32.xlu2 %v1429_v49, %s1778_s26  ;;  %1518 = vrot.lane.b32.xlu0 %v1436_v41, %s1778_s26  ;;  %v1062_v23 = vmul.f32 %v2077_v50, %v2260_v16  ;;  %v2490_v47 = vld [vmem:[#allocation2 + $0x51] sm:$0xff] }
  0xe3   : > { %529 = vst.msk [vmem:[#allocation2 + $0x181] sm:$0xff] %vm279_vm1, %v3261_v18  ;;  %v2475_v18 = vadd.f32 %v1940_v52, %v398_v37  ;;  %v996_v29 = vadd.f32 %v964_v7, %v898_v12  ;;  %v1161_v63 = vmul.f32 %v2143_v42, %v2472_v3  ;;  %v3263_v58 = vmax.f32 %v2480_v4, 0.0  ;;  %v2492_v37 = vld [vmem:[#allocation2 + $0x52] sm:$0xff]  ;;  %v2516_v7 = vld [vmem:[#allocation2 + $0x61] sm:$0xff] }
  0xe4   : > { %506 = vst.msk [vmem:[#allocation2 + $0x69] sm:$0xff] %vm279_vm1, %v3265_v48  ;;  %v1315_v38 = vadd.f32 %v1283_v28, %v1217_v43  ;;  %v1444_v28 = vmax.f32 %v1412_v32, 0.0  ;;  %v605_v49 = vadd.f32 %v1951_v55, %v573_v19  ;;  %v671_v1 = vmul.f32 %v1957_v57, %v2165_v15  ;;  %v2508_v43 = vld [vmem:[#allocation2 + $0x60] sm:$0xff]  ;;  %v2574_v54 = vld [vmem:[#allocation2 + $0x110] sm:$0xff] }
  0xe5   : > { %514 = vst.msk [vmem:[#allocation2 + $0xc9] sm:$0xff] %vm279_vm1, %v3266_v56  ;;  %v3264_v40 = vmax.f32 %v2475_v18, 0.0  ;;  %v1094_v34 = vadd.f32 %v1062_v23, %v996_v29  ;;  %v769_v17 = vmul.f32 %v1980_v2, %v2238_v22  ;;  %v1259_v44 = vmul.f32 %v2156_v45, %v2490_v47  ;;  %v2524_v29 = vld [vmem:[#allocation2 + $0xe0] sm:$0xff]  ;;  %v2581_v46 = vld [vmem:[#allocation2 + $0x111] sm:$0xff] }
  0xe6   : > { %3338 = vst [vmem:[#allocation52_spill] sm:$0xff] %v2475_v18  ;;  %v1413_v52 = vadd.f32 %v1381_v30, %v1315_v38  ;;  %v1357_v41 = vmul.f32 %v2224_v0, %v2492_v37  ;;  %v867_v12 = vmul.f32 %v2007_v13, %v2323_v5  ;;  %v703_v32 = vadd.f32 %v671_v1, %v605_v49  ;;  %v2526_v23 = vld [vmem:[#allocation2 + $0xe1] sm:$0xff] }
  0xe7   : > { %3339 = vst [vmem:[#allocation53_spill] sm:$0xff] %v2480_v4  ;;  %1502 = vrot.lane.b32.xlu1 %v1428_v9, %s1778_s26  ;;  %v1193_v30 = vadd.f32 %v1161_v63, %v1094_v34  ;;  %v581_v22 = vmul.f32 %v1933_v51, %v2179_v24  ;;  %v679_v38 = vmul.f32 %v1957_v57, %v2181_v14 }
  0xe8   : > { %522 = vst.msk [vmem:[#allocation2 + $0x129] sm:$0xff] %vm279_vm1, %v3264_v40  ;;  %v1445_v9 = vmax.f32 %v1413_v52, 0.0  ;;  %v965_v19 = vmul.f32 %v2041_v27, %v2325_v11  ;;  %v1063_v52 = vmul.f32 %v2077_v50, %v2390_v59  ;;  %v1162_v34 = vmul.f32 %v2143_v42, %v2508_v43  ;;  %v2545_v40 = vld [vmem:[#allocation2 + $0xc1] sm:$0xff] }
  0xe9   : > { %530 = vst.msk [vmem:[#allocation2 + $0x189] sm:$0xff] %vm279_vm1, %v3263_v58  ;;  %v1291_v63 = vadd.f32 %v1259_v44, %v1193_v30  ;;  %v801_v24 = vadd.f32 %v769_v17, %v703_v32  ;;  %v1260_v14 = vmul.f32 %v2156_v45, %v2516_v7  ;;  %v613_v49 = vadd.f32 %v1951_v55, %v581_v22  ;;  %v2540_v30 = vld [vmem:[#allocation2 + $0xc0] sm:$0xff] }
  0xea   : > { %3340 = vst [vmem:[#allocation54_spill] sm:$0xff] %v2526_v23  ;;  %1534 = vrot.lane.b32.xlu2 %v1444_v28, %s1778_s26  ;;  %v777_v1 = vmul.f32 %v1980_v2, %v2299_v33  ;;  %1536 = vrot.lane.b32.xlu0 %v1445_v9, %s1778_s26  ;;  %v588_v17 = vmul.f32 %v1933_v51, %v2524_v29  ;;  %v2557_v9 = vld [vmem:[#allocation2 + $0xe2] sm:$0xff] }
  0xeb   : > { %v2518_v15 = vld [vmem:[#allocation2 + $0x62] sm:$0xff]  ;;  %v1389_v44 = vadd.f32 %v1357_v41, %v1291_v63  ;;  %v686_v32 = vmul.f32 %v1957_v57, %v2526_v23  ;;  %v899_v22 = vadd.f32 %v867_v12, %v801_v24  ;;  %v711_v48 = vadd.f32 %v679_v38, %v613_v49  ;;  %3341 = vst [vmem:[#allocation55_spill] sm:$0xff] %v2557_v9  ;;  %v2559_v63 = vld [vmem:[#allocation2 + $0xf8] sm:$0xff] }
  0xec   : > { %v1358_v58 = vmul.f32 %v2224_v0, %v2518_v15  ;;  %v2547_v28 = vld [vmem:[#allocation2 + $0xc2] sm:$0xff]  ;;  %v875_v56 = vmul.f32 %v2007_v13, %v2337_v62  ;;  %v973_v41 = vmul.f32 %v2041_v27, %v2339_v20  ;;  %3342 = vst [vmem:[#allocation56_spill] sm:$0xff] %v2559_v63  ;;  %v1170_v35 = vmul.f32 %v2143_v42, %v2540_v30  ;;  %v2566_v38 = vld [vmem:[#allocation2 + $0xf9] sm:$0xff] }
  0xed   : > { %v1421_v4 = vmax.f32 %v1389_v44, 0.0  ;;  %v620_v12 = vadd.f32 %v1951_v55, %v588_v17  ;;  %v2568_v24 = vld [vmem:[#allocation2 + $0xfa] sm:$0xff]  ;;  %v997_v49 = vadd.f32 %v965_v19, %v899_v22  ;;  %v809_v18 = vadd.f32 %v777_v1, %v711_v48  ;;  %3344 = vst [vmem:[#allocation58_spill] sm:$0xff] %v2574_v54 }
  0xee   : > { %3343 = vst [vmem:[#allocation57_spill] sm:$0xff] %v2568_v24  ;;  %v1268_v8 = vmul.f32 %v2156_v45, %v2545_v40  ;;  %v1366_v44 = vmul.f32 %v2224_v0, %v2547_v28  ;;  %v784_v17 = vmul.f32 %v1980_v2, %v2557_v9  ;;  %v882_v53 = vmul.f32 %v2007_v13, %v2559_v63  ;;  %v2591_v9 = vld [vmem:[#allocation2 + $0x112] sm:$0xff] }
  0xef   : > { %1488 = vrot.lane.b32.xlu1 %v1421_v4, %s1778_s26  ;;  %v718_v33 = vadd.f32 %v686_v32, %v620_v12  ;;  %v574_v48 = vmul.f32 %v1933_v51, %v2240_v36  ;;  %v1095_v19 = vadd.f32 %v1063_v52, %v997_v49  ;;  %v907_v1 = vadd.f32 %v875_v56, %v809_v18 }
  0xf0   : > { %v980_v22 = vmul.f32 %v2041_v27, %v2566_v38  ;;  %v1078_v4 = vmul.f32 %v2077_v50, %v2568_v24  ;;  %v1177_v12 = vmul.f32 %v2143_v42, %v2574_v54  ;;  %v672_v23 = vmul.f32 %v1957_v57, %v2242_v39 }
  0xf1   : > { %v816_v32 = vadd.f32 %v784_v17, %v718_v33  ;;  %v606_v63 = vadd.f32 %v1951_v55, %v574_v48  ;;  %v1194_v36 = vadd.f32 %v1162_v34, %v1095_v19  ;;  %v1005_v52 = vadd.f32 %v973_v41, %v907_v1  ;;  %v2608_v1 = vld [vmem:[#allocation2 + $0x68] sm:$0xff] }
  0xf2   : > { %v1275_v18 = vmul.f32 %v2156_v45, %v2581_v46  ;;  %v770_v56 = vmul.f32 %v1980_v2, %v2260_v16  ;;  %v868_v17 = vmul.f32 %v2007_v13, %v2472_v3  ;;  %v575_v54 = vmul.f32 %v1933_v51, %v2323_v5 }
  0xf3   : > { %v914_v49 = vadd.f32 %v882_v53, %v816_v32  ;;  %v704_v33 = vadd.f32 %v672_v23, %v606_v63  ;;  %v1292_v48 = vadd.f32 %v1260_v14, %v1194_v36  ;;  %v1103_v24 = vadd.f32 %v1071_v60, %v1005_v52 }
  0xf4   : > { %v1373_v39 = vmul.f32 %v2224_v0, %v2591_v9  ;;  %v673_v34 = vmul.f32 %v1957_v57, %v2325_v11  ;;  %v607_v16 = vadd.f32 %v1951_v55, %v575_v54  ;;  %v771_v53 = vmul.f32 %v1980_v2, %v2390_v59  ;;  %v2617_v11 = vld [vmem:[#allocation2 + $0x69] sm:$0xff] }
  0xf5   : > { %v1012_v41 = vadd.f32 %v980_v22, %v914_v49  ;;  %v802_v19 = vadd.f32 %v770_v56, %v704_v33  ;;  %v1390_v23 = vadd.f32 %v1358_v58, %v1292_v48  ;;  %v1202_v63 = vadd.f32 %v1170_v35, %v1103_v24  ;;  %v2625_v56 = vld [vmem:[#allocation2 + $0x6a] sm:$0xff] }
  0xf6   : > { %v966_v5 = vmul.f32 %v2041_v27, %v2490_v47  ;;  %v1064_v60 = vmul.f32 %v2077_v50, %v2492_v37  ;;  %v705_v22 = vadd.f32 %v673_v34, %v607_v16  ;;  %v869_v36 = vmul.f32 %v2007_v13, %v2508_v43 }
  0xf7   : > { %v1110_v14 = vadd.f32 %v1078_v4, %v1012_v41  ;;  %v900_v32 = vadd.f32 %v868_v17, %v802_v19  ;;  %v1422_v54 = vmax.f32 %v1390_v23, 0.0  ;;  %v1300_v52 = vadd.f32 %v1268_v8, %v1202_v63 }
  0xf8   : > { %v1163_v59 = vmul.f32 %v2143_v42, %v2608_v1  ;;  %v967_v35 = vmul.f32 %v2041_v27, %v2516_v7  ;;  %v803_v4 = vadd.f32 %v771_v53, %v705_v22  ;;  %v582_v49 = vmul.f32 %v1933_v51, %v2262_v31 }
  0xf9   : > { %v1209_v58 = vadd.f32 %v1177_v12, %v1110_v14  ;;  %v998_v24 = vadd.f32 %v966_v5, %v900_v32  ;;  %1490 = vrot.lane.b32.xlu2 %v1422_v54, %s1778_s26  ;;  %v1398_v33 = vadd.f32 %v1366_v44, %v1300_v52  ;;  %v1261_v8 = vmul.f32 %v2156_v45, %v2617_v11  ;;  %v3346_v52 = vld [vmem:[#allocation44_spill] sm:$0xff] }
  0xfa   : > { %v1065_v17 = vmul.f32 %v2077_v50, %v2518_v15  ;;  %v680_v48 = vmul.f32 %v1957_v57, %v2264_v61  ;;  %v901_v41 = vadd.f32 %v869_v36, %v803_v4  ;;  %v614_v19 = vadd.f32 %v1951_v55, %v582_v49  ;;  %v2657_v36 = vld [vmem:[#allocation2 + $0xc8] sm:$0xff]  ;;  %v3347_v4 = vld [vmem:[#allocation45_spill] sm:$0xff] }
  0xfb   : > { %v1307_v12 = vadd.f32 %v1275_v18, %v1209_v58  ;;  %v1096_v34 = vadd.f32 %v1064_v60, %v998_v24  ;;  %v1430_v16 = vmax.f32 %v1398_v33, 0.0  ;;  %v1359_v51 = vmul.f32 %v2224_v0, %v2625_v56  ;;  %v2651_v18 = vld [vmem:[%s3189_s3] ss:$0 sm:$0xff]  ;;  %v2676_v33 = vld [vmem:[#allocation2 + $0xca] sm:$0xff] }
  0xfc   : > { %v778_v31 = vmul.f32 %v1980_v2, %v2297_v10  ;;  %v876_v44 = vmul.f32 %v2007_v13, %v2404_v6  ;;  %v999_v63 = vadd.f32 %v967_v35, %v901_v41  ;;  %v712_v5 = vadd.f32 %v680_v48, %v614_v19 }
  0xfd   : > { %v1405_v53 = vadd.f32 %v1373_v39, %v1307_v12  ;;  %v1195_v23 = vadd.f32 %v1163_v59, %v1096_v34  ;;  %1506 = vrot.lane.b32.xlu0 %v1430_v16, %s1778_s26  ;;  %v1164_v61 = vmul.f32 %v2143_v42, %v2031_v25  ;;  %v1262_v55 = vmul.f32 %v2156_v45, %v2033_v26  ;;  %v2659_v25 = vld [vmem:[#allocation2 + $0xc9] sm:$0xff]  ;;  %v3345_v26 = vld [vmem:[#allocation16_spill] sm:$0xff] }
  0xfe   : > { %v583_v10 = vmul.f32 %v2651_v18, %v2337_v62  ;;  %v681_v39 = vmul.f32 %v1957_v57, %v2339_v20  ;;  %v1097_v32 = vadd.f32 %v1065_v17, %v999_v63  ;;  %v810_v22 = vadd.f32 %v778_v31, %v712_v5  ;;  %v2668_v62 = vld [vmem:[%s3190_s4] ss:$0 sm:$0xff] }
  0xff   : > { %v1437_v60 = vmax.f32 %v1405_v53, 0.0  ;;  %v1293_v14 = vadd.f32 %v1261_v8, %v1195_v23  ;;  %v1360_v54 = vmul.f32 %v2224_v0, %v3345_v26  ;;  %v974_v59 = vmul.f32 %v2041_v27, %v3346_v52  ;;  %v3348_v5 = vld [vmem:[#allocation13_spill] sm:$0xff] }
 0x100   : > { %v615_v57 = vadd.f32 %v2668_v62, %v583_v10  ;;  %v779_v20 = vmul.f32 %v1980_v2, %v2419_v21  ;;  %v1196_v58 = vadd.f32 %v1164_v61, %v1097_v32  ;;  %v908_v24 = vadd.f32 %v876_v44, %v810_v22  ;;  %v2715_v26 = vld [vmem:[%s3189_s3 + $0x3] ss:$0 sm:$0xff] }
 0x101   : > { %1520 = vrot.lane.b32.xlu1 %v1437_v60, %s1778_s26  ;;  %v1391_v35 = vadd.f32 %v1359_v51, %v1293_v14  ;;  %v1072_v49 = vmul.f32 %v2077_v50, %v3347_v4  ;;  %v1171_v8 = vmul.f32 %v2143_v42, %v2657_v36  ;;  %v1269_v17 = vmul.f32 %v2156_v45, %v2659_v25 }
 0x102   : > { %v713_v48 = vadd.f32 %v681_v39, %v615_v57  ;;  %v877_v2 = vmul.f32 %v2007_v13, %v2540_v30  ;;  %v1294_v12 = vadd.f32 %v1262_v55, %v1196_v58  ;;  %v1006_v34 = vadd.f32 %v974_v59, %v908_v24  ;;  %v3349_v55 = vld [vmem:[#allocation14_spill] sm:$0xff]  ;;  %v2708_v39 = vld [vmem:[%s3189_s3 + $0x2] ss:$0 sm:$0xff]  ;;  %v3350_v59 = vld [vmem:[#allocation20_spill] sm:$0xff] }
 0x103   : > { %v1423_v21 = vmax.f32 %v1391_v35, 0.0  ;;  %v584_v41 = vmul.f32 %v2651_v18, %v2404_v6  ;;  %v1367_v19 = vmul.f32 %v2224_v0, %v2676_v33  ;;  %v975_v51 = vmul.f32 %v2041_v27, %v2545_v40  ;;  %v2697_v6 = vld [vmem:[%s3189_s3 + $0x1] ss:$0 sm:$0xff]  ;;  %v3352_v58 = vld [vmem:[#allocation28_spill] sm:$0xff] }
 0x104   : > { %v811_v16 = vadd.f32 %v779_v20, %v713_v48  ;;  %v1073_v31 = vmul.f32 %v2077_v50, %v2547_v28  ;;  %v1392_v44 = vadd.f32 %v1360_v54, %v1294_v12  ;;  %v1104_v13 = vadd.f32 %v1072_v49, %v1006_v34  ;;  %v3351_v20 = vld [vmem:[#allocation27_spill] sm:$0xff] }
 0x105   : > { %1492 = vrot.lane.b32.xlu2 %v1423_v21, %s1778_s26  ;;  %v616_v53 = vadd.f32 %v2668_v62, %v584_v41  ;;  %v682_v23 = vmul.f32 %v2697_v6, %v3346_v52  ;;  %v1172_v61 = vmul.f32 %v2143_v42, %v3348_v5  ;;  %v1270_v10 = vmul.f32 %v2156_v45, %v3349_v55  ;;  %v3353_v34 = vld [vmem:[#allocation35_spill] sm:$0xff]  ;;  %v3357_v5 = vld [vmem:[#allocation25_spill] sm:$0xff] }
 0x106   : > { %v909_v63 = vadd.f32 %v877_v2, %v811_v16  ;;  %v780_v60 = vmul.f32 %v2708_v39, %v3347_v4  ;;  %v1424_v14 = vmax.f32 %v1392_v44, 0.0  ;;  %v1203_v32 = vadd.f32 %v1171_v8, %v1104_v13  ;;  %v3354_v44 = vld [vmem:[#allocation54_spill] sm:$0xff] }
 0x107   : > { %v714_v22 = vadd.f32 %v682_v23, %v616_v53  ;;  %v878_v54 = vmul.f32 %v2715_v26, %v2657_v36  ;;  %v1368_v57 = vmul.f32 %v2224_v0, %v3350_v59  ;;  %v597_v35 = vmul.f32 %v2651_v18, %v3351_v20  ;;  %v3355_v13 = vld [vmem:[#allocation42_spill] sm:$0xff] }
 0x108   : > { %v1007_v52 = vadd.f32 %v975_v51, %v909_v63  ;;  %v695_v24 = vmul.f32 %v2697_v6, %v3352_v58  ;;  %1494 = vrot.lane.b32.xlu0 %v1424_v14, %s1778_s26  ;;  %v1301_v4 = vadd.f32 %v1269_v17, %v1203_v32  ;;  %v976_v8 = vmul.f32 %v2041_v27, %v2659_v25  ;;  %v2739_v63 = vld [vmem:[#allocation2 + $0x180] sm:$0xff] }
 0x109   : > { %v812_v49 = vadd.f32 %v780_v60, %v714_v22  ;;  %v1074_v48 = vmul.f32 %v2077_v50, %v2676_v33  ;;  %v1173_v21 = vmul.f32 %v2143_v42, %v2524_v29  ;;  %v629_v12 = vadd.f32 %v2668_v62, %v597_v35  ;;  %v3358_v60 = vld [vmem:[#allocation26_spill] sm:$0xff]  ;;  %v3359_v22 = vld [vmem:[#allocation55_spill] sm:$0xff] }
 0x10a   : > { %v1105_v2 = vadd.f32 %v1073_v31, %v1007_v52  ;;  %v793_v41 = vmul.f32 %v2708_v39, %v3353_v34  ;;  %v1399_v16 = vadd.f32 %v1367_v19, %v1301_v4  ;;  %v1271_v17 = vmul.f32 %v2156_v45, %v3354_v44  ;;  %v2741_v31 = vld [vmem:[#allocation2 + $0x181] sm:$0xff]  ;;  %v3360_v52 = vld [vmem:[#allocation43_spill] sm:$0xff] }
 0x10b   : > { %v910_v51 = vadd.f32 %v878_v54, %v812_v49  ;;  %v891_v27 = vmul.f32 %v2715_v26, %v3355_v13  ;;  %v727_v23 = vadd.f32 %v695_v24, %v629_v12  ;;  %3356 = vst [vmem:[#allocation16_spill] sm:$0xff] %v2741_v31  ;;  %v589_v55 = vmul.f32 %v2651_v18, %v3357_v5  ;;  %v2756_v58 = vld [vmem:[#allocation2 + $0x182] sm:$0xff]  ;;  %v3364_v13 = vld [vmem:[#allocation40_spill] sm:$0xff] }
 0x10c   : > { %v1204_v53 = vadd.f32 %v1172_v61, %v1105_v2  ;;  %v687_v14 = vmul.f32 %v2697_v6, %v3358_v60  ;;  %v1431_v19 = vmax.f32 %v1399_v16, 0.0  ;;  %v1369_v54 = vmul.f32 %v2224_v0, %v3359_v22  ;;  %v2752_v61 = vld [vmem:[%s3189_s3 + $0x4] ss:$0 sm:$0xff]  ;;  %3361 = vst [vmem:[#allocation44_spill] sm:$0xff] %v2756_v58  ;;  %v3362_v4 = vld [vmem:[#allocation34_spill] sm:$0xff]  ;;  %v3363_v2 = vld [vmem:[#allocation51_spill] sm:$0xff] }
 0x10d   : > { %v1008_v32 = vadd.f32 %v976_v8, %v910_v51  ;;  %v989_v59 = vmul.f32 %v2752_v61, %v3360_v52  ;;  %v825_v35 = vadd.f32 %v793_v41, %v727_v23  ;;  %v621_v24 = vadd.f32 %v2668_v62, %v589_v55  ;;  %v2770_v23 = vld [vmem:[#allocation2 + $0x120] sm:$0xff] }
 0x10e   : > { %v1302_v20 = vadd.f32 %v1270_v10, %v1204_v53  ;;  %v785_v49 = vmul.f32 %v2708_v39, %v3362_v4  ;;  %1508 = vrot.lane.b32.xlu1 %v1431_v19, %s1778_s26  ;;  %v1087_v12 = vmul.f32 %v2077_v50, %v3363_v2  ;;  %v1186_v34 = vmul.f32 %v2143_v42, %v2739_v63  ;;  %v2774_v55 = vld [vmem:[#allocation2 + $0x121] sm:$0xff]  ;;  %v3365_v50 = vld [vmem:[#allocation56_spill] sm:$0xff] }
 0x10f   : > { %v1106_v8 = vadd.f32 %v1074_v48, %v1008_v32  ;;  %v1284_v10 = vmul.f32 %v2156_v45, %v2741_v31  ;;  %v923_v16 = vadd.f32 %v891_v27, %v825_v35  ;;  %v719_v51 = vadd.f32 %v687_v14, %v621_v24  ;;  %v3366_v32 = vld [vmem:[#allocation41_spill] sm:$0xff]  ;;  %v3367_v35 = vld [vmem:[#allocation50_spill] sm:$0xff] }
 0x110   : > { %v1400_v41 = vadd.f32 %v1368_v57, %v1302_v20  ;;  %v883_v53 = vmul.f32 %v2715_v26, %v3364_v13  ;;  %v1382_v48 = vmul.f32 %v2224_v0, %v2756_v58  ;;  %v590_v60 = vmul.f32 %v2651_v18, %v3365_v50 }
 0x111   : > { %v1205_v5 = vadd.f32 %v1173_v21, %v1106_v8  ;;  %v688_v19 = vmul.f32 %v2697_v6, %v2566_v38  ;;  %v1021_v27 = vadd.f32 %v989_v59, %v923_v16  ;;  %v817_v14 = vadd.f32 %v785_v49, %v719_v51  ;;  %v2785_v21 = vld [vmem:[%s3189_s3 + $0x5] ss:$0 sm:$0xff] }
 0x112   : > { %v1432_v57 = vmax.f32 %v1400_v41, 0.0  ;;  %v981_v52 = vmul.f32 %v2752_v61, %v3366_v32  ;;  %v1079_v24 = vmul.f32 %v2785_v21, %v3367_v35  ;;  %v1178_v4 = vmul.f32 %v2143_v42, %v2770_v23  ;;  %v2791_v8 = vld [vmem:[#allocation2 + $0x122] sm:$0xff] }
 0x113   : > { %v1303_v20 = vadd.f32 %v1271_v17, %v1205_v5  ;;  %v622_v59 = vadd.f32 %v2668_v62, %v590_v60  ;;  %v1119_v49 = vadd.f32 %v1087_v12, %v1021_v27  ;;  %v915_v2 = vadd.f32 %v883_v53, %v817_v14  ;;  %v3368_v41 = vld [vmem:[#allocation57_spill] sm:$0xff]  ;;  %v3369_v5 = vld [vmem:[#allocation58_spill] sm:$0xff] }
 0x114   : > { %1510 = vrot.lane.b32.xlu2 %v1432_v57, %s1778_s26  ;;  %v1276_v17 = vmul.f32 %v2156_v45, %v2774_v55  ;;  %v786_v16 = vmul.f32 %v2708_v39, %v3368_v41  ;;  %v884_v32 = vmul.f32 %v2715_v26, %v3369_v5  ;;  %v2801_v35 = vld [vmem:[#allocation2 + $0x128] sm:$0xff]  ;;  %v576_v60 = vmul.f32 %v2651_v18, %v2472_v3 }
 0x115   : > { %v1401_v51 = vadd.f32 %v1369_v54, %v1303_v20  ;;  %v720_v13 = vadd.f32 %v688_v19, %v622_v59  ;;  %v1218_v58 = vadd.f32 %v1186_v34, %v1119_v49  ;;  %v1013_v57 = vadd.f32 %v981_v52, %v915_v2  ;;  %v2809_v54 = vld [vmem:[#allocation2 + $0x129] sm:$0xff] }
 0x116   : > { %v1374_v12 = vmul.f32 %v2224_v0, %v2791_v8  ;;  %v982_v53 = vmul.f32 %v2752_v61, %v2581_v46  ;;  %v608_v19 = vadd.f32 %v2668_v62, %v576_v60  ;;  %v674_v20 = vmul.f32 %v2697_v6, %v2490_v47 }
 0x117   : > { %v1433_v27 = vmax.f32 %v1401_v51, 0.0  ;;  %v818_v14 = vadd.f32 %v786_v16, %v720_v13  ;;  %v1316_v59 = vadd.f32 %v1284_v10, %v1218_v58  ;;  %v1111_v31 = vadd.f32 %v1079_v24, %v1013_v57  ;;  %v2825_v10 = vld [vmem:[#allocation2 + $0x12a] sm:$0xff] }
 0x118   : > { %v1080_v3 = vmul.f32 %v2785_v21, %v2591_v9  ;;  %v1179_v34 = vmul.f32 %v2143_v42, %v2801_v35  ;;  %v706_v49 = vadd.f32 %v674_v20, %v608_v19  ;;  %v772_v2 = vmul.f32 %v2708_v39, %v2492_v37  ;;  %v2850_v19 = vld [vmem:[%s3189_s3 + $0x7] ss:$0 sm:$0xff] }
 0x119   : > { %1512 = vrot.lane.b32.xlu0 %v1433_v27, %s1778_s26  ;;  %v916_v52 = vadd.f32 %v884_v32, %v818_v14  ;;  %v870_v16 = vmul.f32 %v2715_v26, %v2608_v1  ;;  %v1414_v51 = vadd.f32 %v1382_v48, %v1316_v59  ;;  %v1210_v47 = vadd.f32 %v1178_v4, %v1111_v31  ;;  %v1758_v14 = vld [vmem:[#allocation2 + $0x80] sm:$0xff] }
 0x11a   : > { %v1277_v58 = vmul.f32 %v2156_v45, %v2809_v54  ;;  %v577_v42 = vmul.f32 %v2651_v18, %v2508_v43  ;;  %v804_v13 = vadd.f32 %v772_v2, %v706_v49  ;;  %v968_v32 = vmul.f32 %v2752_v61, %v2617_v11 }
 0x11b   : > { %v1014_v24 = vadd.f32 %v982_v53, %v916_v52  ;;  %v675_v37 = vmul.f32 %v2697_v6, %v2516_v7  ;;  %v1446_v60 = vmax.f32 %v1414_v51, 0.0  ;;  %v1308_v57 = vadd.f32 %v1276_v17, %v1210_v47  ;;  %v2844_v7 = vld [vmem:[%s3189_s3 + $0x6] ss:$0 sm:$0xff]  ;;  %v1763_v47 = vld [vmem:[#allocation2 + $0x78] sm:$0xff] }
 0x11c   : > { %v609_v31 = vadd.f32 %v2668_v62, %v577_v42  ;;  %v773_v45 = vmul.f32 %v2708_v39, %v2518_v15  ;;  %v1375_v4 = vmul.f32 %v2224_v0, %v2825_v10  ;;  %v902_v43 = vadd.f32 %v870_v16, %v804_v13  ;;  %v1760_v15 = vld [vmem:[#allocation2 + $0x81] sm:$0xff] }
 0x11d   : > { %v1112_v48 = vadd.f32 %v1080_v3, %v1014_v24  ;;  %v1066_v53 = vmul.f32 %v2785_v21, %v2625_v56  ;;  %1538 = vrot.lane.b32.xlu1 %v1446_v60, %s1778_s26  ;;  %v1406_v27 = vadd.f32 %v1374_v12, %v1308_v57  ;;  %v1165_v17 = vmul.f32 %v2844_v7, %v1758_v14  ;;  %v1762_v12 = vld [vmem:[#allocation2 + $0x82] sm:$0xff]  ;;  %v1764_v57 = vld [vmem:[#allocation2 + $0x79] sm:$0xff] }
 0x11e   : > { %v1263_v20 = vmul.f32 %v2850_v19, %v1760_v15  ;;  %v707_v59 = vadd.f32 %v675_v37, %v609_v31  ;;  %v1000_v52 = vadd.f32 %v968_v32, %v902_v43  ;;  %v1361_v49 = vmul.f32 %v1762_v12, %v2224_v0  ;;  %v1765_v31 = vld [vmem:[#allocation2 + $0x7a] sm:$0xff]  ;;  %v1034_v12 = vld [vmem:[#allocation2 + $0x82] sm:$0xff] }
 0x11f   : > { %v1211_v3 = vadd.f32 %v1179_v34, %v1112_v48  ;;  %v578_v2 = vmul.f32 %v2651_v18, %v2608_v1  ;;  %v1438_v16 = vmax.f32 %v1406_v27, 0.0  ;;  %v871_v42 = vmul.f32 %v1763_v47, %v2715_v26  ;;  %v1766_v48 = vld [vmem:[#allocation2 + $0x90] sm:$0xff] }
 0x120   : > { %v805_v51 = vadd.f32 %v773_v45, %v707_v59  ;;  %v676_v24 = vmul.f32 %v2697_v6, %v2617_v11  ;;  %v1098_v60 = vadd.f32 %v1066_v53, %v1000_v52  ;;  %v774_v34 = vmul.f32 %v2708_v39, %v2625_v56  ;;  %v838_v11 = vld [vmem:[#allocation2 + $0x80] sm:$0xff]  ;;  %v1767_v27 = vld [vmem:[#allocation2 + $0x91] sm:$0xff] }
 0x121   : > { %v1309_v13 = vadd.f32 %v1277_v58, %v1211_v3  ;;  %v610_v37 = vadd.f32 %v2668_v62, %v578_v2  ;;  %1522 = vrot.lane.b32.xlu2 %v1438_v16, %s1778_s26  ;;  %v969_v1 = vmul.f32 %v1764_v57, %v2752_v61  ;;  %v1067_v45 = vmul.f32 %v1765_v31, %v2785_v21  ;;  %v936_v56 = vld [vmem:[#allocation2 + $0x81] sm:$0xff]  ;;  %v3370_v3 = vld [vmem:[#allocation32_spill] sm:$0xff] }
 0x122   : > { %v903_v32 = vadd.f32 %v871_v42, %v805_v51  ;;  %v1166_v43 = vmul.f32 %v1766_v48, %v2844_v7  ;;  %v1197_v53 = vadd.f32 %v1165_v17, %v1098_v60  ;;  %v1264_v14 = vmul.f32 %v1767_v27, %v2850_v19  ;;  %v1133_v2 = vld [vmem:[#allocation2 + $0x98] sm:$0xff]  ;;  %v2885_v48 = vld [vmem:[%s3189_s3 + $0x8] ss:$0 sm:$0xff]  ;;  %v1140_v27 = vld [vmem:[#allocation2 + $0xf0] sm:$0xff] }
 0x123   : > { %v1407_v58 = vadd.f32 %v1375_v4, %v1309_v13  ;;  %v708_v15 = vadd.f32 %v676_v24, %v610_v37  ;;  %v1362_v52 = vmul.f32 %v2224_v0, %v3370_v3  ;;  %v585_v16 = vmul.f32 %v2651_v18, %v2540_v30  ;;  %v1231_v13 = vld [vmem:[#allocation2 + $0x99] sm:$0xff] }
 0x124   : > { %v1001_v59 = vadd.f32 %v969_v1, %v903_v32  ;;  %v683_v51 = vmul.f32 %v2697_v6, %v2545_v40  ;;  %v1295_v4 = vadd.f32 %v1263_v20, %v1197_v53  ;;  %v872_v42 = vmul.f32 %v2715_v26, %v838_v11  ;;  %v1329_v24 = vld [vmem:[#allocation2 + $0x9a] sm:$0xff] }
 0x125   : > { %v1439_v47 = vmax.f32 %v1407_v58, 0.0  ;;  %v806_v17 = vadd.f32 %v774_v34, %v708_v15  ;;  %v970_v37 = vmul.f32 %v2752_v61, %v936_v56  ;;  %v617_v0 = vadd.f32 %v2668_v62, %v585_v16  ;;  %v845_v34 = vld [vmem:[#allocation2 + $0xd8] sm:$0xff] }
 0x126   : > { %v1099_v60 = vadd.f32 %v1067_v45, %v1001_v59  ;;  %v781_v32 = vmul.f32 %v2708_v39, %v2547_v28  ;;  %v1393_v30 = vadd.f32 %v1361_v49, %v1295_v4  ;;  %v1068_v40 = vmul.f32 %v2785_v21, %v1034_v12  ;;  %v943_v1 = vld [vmem:[#allocation2 + $0xd9] sm:$0xff]  ;;  %v1238_v15 = vld [vmem:[#allocation2 + $0xf1] sm:$0xff] }
 0x127   : > { %1524 = vrot.lane.b32.xlu0 %v1439_v47, %s1778_s26  ;;  %v904_v57 = vadd.f32 %v872_v42, %v806_v17  ;;  %v1167_v20 = vmul.f32 %v2844_v7, %v1133_v2  ;;  %v1265_v45 = vmul.f32 %v2850_v19, %v1231_v13  ;;  %v1363_v28 = vmul.f32 %v2885_v48, %v1329_v24  ;;  %v1041_v58 = vld [vmem:[#allocation2 + $0xda] sm:$0xff]  ;;  %v1336_v16 = vld [vmem:[#allocation2 + $0xf2] sm:$0xff] }
 0x128   : > { %v1198_v31 = vadd.f32 %v1166_v43, %v1099_v60  ;;  %v715_v11 = vadd.f32 %v683_v51, %v617_v0  ;;  %v1425_v49 = vmax.f32 %v1393_v30, 0.0  ;;  %v586_v56 = vmul.f32 %v2651_v18, %v2657_v36 }
 0x129   : > { %v1002_v53 = vadd.f32 %v970_v37, %v904_v57  ;;  %v684_v43 = vmul.f32 %v2697_v6, %v2659_v25  ;;  %v879_v12 = vmul.f32 %v2715_v26, %v845_v34  ;;  %v977_v2 = vmul.f32 %v2752_v61, %v943_v1  ;;  %v557_v34 = vld [vmem:[#allocation2 + $0x108] sm:$0xff] }
 0x12a   : > { %v1296_v59 = vadd.f32 %v1264_v14, %v1198_v31  ;;  %v813_v3 = vadd.f32 %v781_v32, %v715_v11  ;;  %1496 = vrot.lane.b32.xlu1 %v1425_v49, %s1778_s26  ;;  %v1075_v47 = vmul.f32 %v2785_v21, %v1041_v58  ;;  %v618_v4 = vadd.f32 %v2668_v62, %v586_v56  ;;  %v655_v1 = vld [vmem:[#allocation2 + $0x109] sm:$0xff]  ;;  %v853_v58 = vld [vmem:[#allocation2 + $0x138] sm:$0xff] }
 0x12b   : > { %v1100_v51 = vadd.f32 %v1068_v40, %v1002_v53  ;;  %v782_v36 = vmul.f32 %v2708_v39, %v2676_v33  ;;  %v1174_v25 = vmul.f32 %v2844_v7, %v1140_v27  ;;  %v1272_v14 = vmul.f32 %v2850_v19, %v1238_v15  ;;  %v951_v56 = vld [vmem:[#allocation2 + $0x139] sm:$0xff] }
 0x12c   : > { %v1394_v17 = vadd.f32 %v1362_v52, %v1296_v59  ;;  %v911_v42 = vadd.f32 %v879_v12, %v813_v3  ;;  %v1370_v24 = vmul.f32 %v2885_v48, %v1336_v16  ;;  %v716_v60 = vadd.f32 %v684_v43, %v618_v4  ;;  %v753_v43 = vld [vmem:[#allocation2 + $0x10a] sm:$0xff] }
 0x12d   : > { %v1199_v13 = vadd.f32 %v1167_v20, %v1100_v51  ;;  %v593_v37 = vmul.f32 %v2651_v18, %v2770_v23  ;;  %v880_v30 = vmul.f32 %v2715_v26, %v2524_v29  ;;  %v691_v33 = vmul.f32 %v2697_v6, %v2774_v55  ;;  %v1148_v12 = vld [vmem:[#allocation2 + $0x150] sm:$0xff] }
 0x12e   : > { %v1426_v0 = vmax.f32 %v1394_v17, 0.0  ;;  %v1009_v32 = vadd.f32 %v977_v2, %v911_v42  ;;  %v814_v57 = vadd.f32 %v782_v36, %v716_v60  ;;  %v789_v20 = vmul.f32 %v2708_v39, %v2791_v8  ;;  %v1344_v60 = vld [vmem:[#allocation2 + $0x152] sm:$0xff] }
 0x12f   : > { %v1297_v52 = vadd.f32 %v1265_v45, %v1199_v13  ;;  %v625_v40 = vadd.f32 %v2668_v62, %v593_v37  ;;  %v978_v11 = vmul.f32 %v2752_v61, %v3354_v44  ;;  %v1076_v29 = vmul.f32 %v2785_v21, %v3359_v22  ;;  %v1049_v44 = vld [vmem:[#allocation2 + $0x13a] sm:$0xff] }
 0x130   : > { %1498 = vrot.lane.b32.xlu2 %v1426_v0, %s1778_s26  ;;  %v1107_v31 = vadd.f32 %v1075_v47, %v1009_v32  ;;  %v1175_v45 = vmul.f32 %v2844_v7, %v3365_v50  ;;  %v912_v53 = vadd.f32 %v880_v30, %v814_v57  ;;  %v1273_v27 = vmul.f32 %v2850_v19, %v2566_v38  ;;  %v1246_v47 = vld [vmem:[#allocation2 + $0x151] sm:$0xff] }
 0x131   : > { %v1395_v49 = vadd.f32 %v1363_v28, %v1297_v52  ;;  %v723_v15 = vadd.f32 %v691_v33, %v625_v40  ;;  %v1371_v3 = vmul.f32 %v2885_v48, %v3368_v41  ;;  %v591_v22 = vmul.f32 %v2651_v18, %v557_v34 }
 0x132   : > { %v1206_v59 = vadd.f32 %v1174_v25, %v1107_v31  ;;  %v689_v2 = vmul.f32 %v2697_v6, %v655_v1  ;;  %v1010_v16 = vadd.f32 %v978_v11, %v912_v53  ;;  %v887_v51 = vmul.f32 %v2715_v26, %v853_v58 }
 0x133   : > { %v1427_v50 = vmax.f32 %v1395_v49, 0.0  ;;  %v821_v28 = vadd.f32 %v789_v20, %v723_v15  ;;  %v985_v4 = vmul.f32 %v2752_v61, %v951_v56  ;;  %v623_v36 = vadd.f32 %v2668_v62, %v591_v22  ;;  %v1147_v22 = vld [vmem:[#allocation2 + $0x140] sm:$0xff] }
 0x134   : > { %v1304_v38 = vadd.f32 %v1272_v14, %v1206_v59  ;;  %v787_v17 = vmul.f32 %v2708_v39, %v753_v43  ;;  %v1108_v41 = vadd.f32 %v1076_v29, %v1010_v16  ;;  %v1083_v25 = vmul.f32 %v2785_v21, %v1049_v44  ;;  %v565_v29 = vld [vmem:[#allocation2 + $0x168] sm:$0xff] }
 0x135   : > { %1500 = vrot.lane.b32.xlu0 %v1427_v50, %s1778_s26  ;;  %v919_v42 = vadd.f32 %v887_v51, %v821_v28  ;;  %v1182_v13 = vmul.f32 %v2844_v7, %v1148_v12  ;;  %v1280_v0 = vmul.f32 %v2850_v19, %v1246_v47  ;;  %v721_v32 = vadd.f32 %v689_v2, %v623_v36  ;;  %v761_v43 = vld [vmem:[#allocation2 + $0x16a] sm:$0xff]  ;;  %v1245_v2 = vld [vmem:[#allocation2 + $0x141] sm:$0xff] }
 0x136   : > { %v1402_v37 = vadd.f32 %v1370_v24, %v1304_v38  ;;  %v885_v14 = vmul.f32 %v2715_v26, %v2770_v23  ;;  %v1207_v30 = vadd.f32 %v1175_v45, %v1108_v41  ;;  %v592_v52 = vmul.f32 %v2651_v18, %v3369_v5  ;;  %v663_v45 = vld [vmem:[#allocation2 + $0x169] sm:$0xff] }
 0x137   : > { %v1017_v33 = vadd.f32 %v985_v4, %v919_v42  ;;  %v690_v57 = vmul.f32 %v2697_v6, %v2581_v46  ;;  %v1378_v20 = vmul.f32 %v2885_v48, %v1344_v60  ;;  %v819_v34 = vadd.f32 %v787_v17, %v721_v32  ;;  %v1343_v42 = vld [vmem:[#allocation2 + $0x142] sm:$0xff]  ;;  %v1154_v60 = vld [vmem:[#allocation2 + $0x198] sm:$0xff] }
 0x138   : > { %v1434_v40 = vmax.f32 %v1402_v37, 0.0  ;;  %v983_v24 = vmul.f32 %v2752_v61, %v2774_v55  ;;  %v1305_v1 = vadd.f32 %v1273_v27, %v1207_v30  ;;  %v1081_v23 = vmul.f32 %v2785_v21, %v2791_v8  ;;  %v3371_v30 = vld [vmem:[#allocation16_spill] sm:$0xff] }
 0x139   : > { %v1115_v31 = vadd.f32 %v1083_v25, %v1017_v33  ;;  %v624_v11 = vadd.f32 %v2668_v62, %v592_v52  ;;  %v917_v5 = vadd.f32 %v885_v14, %v819_v34  ;;  %v1180_v46 = vmul.f32 %v2844_v7, %v853_v58  ;;  %v1252_v52 = vld [vmem:[#allocation2 + $0x199] sm:$0xff] }
 0x13a   : > { %1514 = vrot.lane.b32.xlu1 %v1434_v40, %s1778_s26  ;;  %v1278_v49 = vmul.f32 %v2850_v19, %v951_v56  ;;  %v788_v53 = vmul.f32 %v2708_v39, %v2591_v9  ;;  %v1403_v55 = vadd.f32 %v1371_v3, %v1305_v1  ;;  %v886_v8 = vmul.f32 %v2715_v26, %v2801_v35  ;;  %v1350_v34 = vld [vmem:[#allocation2 + $0x19a] sm:$0xff] }
 0x13b   : > { %v1214_v27 = vadd.f32 %v1182_v13, %v1115_v31  ;;  %v722_v15 = vadd.f32 %v690_v57, %v624_v11  ;;  %v1015_v59 = vadd.f32 %v983_v24, %v917_v5  ;;  %v1376_v12 = vmul.f32 %v2885_v48, %v1049_v44  ;;  %v1247_v1 = vld [vmem:[#allocation2 + $0x159] sm:$0xff] }
 0x13c   : > { %v599_v50 = vmul.f32 %v2651_v18, %v565_v29  ;;  %v697_v58 = vmul.f32 %v2697_v6, %v663_v45  ;;  %v1435_v56 = vmax.f32 %v1403_v55, 0.0  ;;  %v984_v9 = vmul.f32 %v2752_v61, %v2809_v54  ;;  %v3372_v11 = vld [vmem:[#allocation44_spill] sm:$0xff]  ;;  %v1483_v45 = vpop.permute.xlu0 %1482 }
 0x13d   : > { %v1312_v16 = vadd.f32 %v1280_v0, %v1214_v27  ;;  %v820_v28 = vadd.f32 %v788_v53, %v722_v15  ;;  %v1113_v3 = vadd.f32 %v1081_v23, %v1015_v59  ;;  %v1082_v51 = vmul.f32 %v2785_v21, %v2825_v10  ;;  %v2967_v0 = vpop.permute.xlu2 %1504  ;;  %v1345_v55 = vld [vmem:[#allocation2 + $0x15a] sm:$0xff] }
 0x13e   : > { %v631_v47 = vadd.f32 %v2668_v62, %v599_v50  ;;  %v795_v44 = vmul.f32 %v2708_v39, %v761_v43  ;;  %1516 = vrot.lane.b32.xlu2 %v1435_v56, %s1778_s26  ;;  %v1181_v36 = vmul.f32 %v2844_v7, %v1147_v22  ;;  %v1279_v17 = vmul.f32 %v2850_v19, %v1245_v2  ;;  %v858_v56 = vld [vmem:[#allocation2 + $0x170] sm:$0xff] }
 0x13f   : > { %v1410_v38 = vadd.f32 %v1378_v20, %v1312_v16  ;;  %v918_v4 = vadd.f32 %v886_v8, %v820_v28  ;;  %v1212_v41 = vadd.f32 %v1180_v46, %v1113_v3  ;;  %v893_v13 = vmul.f32 %v2715_v26, %v2739_v63 }
 0x140   : > { %v729_v25 = vadd.f32 %v697_v58, %v631_v47  ;;  %v594_v37 = vmul.f32 %v2651_v18, %v2801_v35  ;;  %v991_v33 = vmul.f32 %v2752_v61, %v3371_v30  ;;  %v692_v57 = vmul.f32 %v2697_v6, %v2809_v54  ;;  %v1149_v35 = vld [vmem:[#allocation2 + $0x158] sm:$0xff] }
 0x141   : > { %v1442_v32 = vmax.f32 %v1410_v38, 0.0  ;;  %v1016_v14 = vadd.f32 %v984_v9, %v918_v4  ;;  %v1310_v40 = vadd.f32 %v1278_v49, %v1212_v41  ;;  %v790_v24 = vmul.f32 %v2708_v39, %v2825_v10  ;;  %v956_v38 = vld [vmem:[#allocation2 + $0x171] sm:$0xff] }
 0x142   : > { %v827_v20 = vadd.f32 %v795_v44, %v729_v25  ;;  %v626_v63 = vadd.f32 %v2668_v62, %v594_v37  ;;  %v1377_v23 = vmul.f32 %v2885_v48, %v1343_v42  ;;  %v1089_v29 = vmul.f32 %v2785_v21, %v3372_v11  ;;  %v1054_v25 = vld [vmem:[#allocation2 + $0x172] sm:$0xff]  ;;  %v1349_v11 = vld [vmem:[#allocation2 + $0x18a] sm:$0xff] }
 0x143   : > { %1530 = vrot.lane.b32.xlu0 %v1442_v32, %s1778_s26  ;;  %v1114_v31 = vadd.f32 %v1082_v51, %v1016_v14  ;;  %v1188_v54 = vmul.f32 %v2844_v7, %v1154_v60  ;;  %v1408_v5 = vadd.f32 %v1376_v12, %v1310_v40  ;;  %v1286_v49 = vmul.f32 %v2850_v19, %v1252_v52  ;;  %v1251_v52 = vld [vmem:[#allocation2 + $0x189] sm:$0xff] }
 0x144   : > { %v925_v46 = vadd.f32 %v893_v13, %v827_v20  ;;  %v724_v53 = vadd.f32 %v692_v57, %v626_v63  ;;  %v1384_v27 = vmul.f32 %v2885_v48, %v1350_v34  ;;  %v598_v15 = vmul.f32 %v2651_v18, %v1149_v35  ;;  %v1153_v13 = vld [vmem:[#allocation2 + $0x188] sm:$0xff] }
 0x145   : > { %v1213_v10 = vadd.f32 %v1181_v36, %v1114_v31  ;;  %v696_v8 = vmul.f32 %v2697_v6, %v1247_v1  ;;  %v1440_v43 = vmax.f32 %v1408_v5, 0.0  ;;  %v888_v58 = vmul.f32 %v2715_v26, %v1147_v22  ;;  %v1535_v32 = vpop.permute.xlu2 %1534  ;;  %v3375_v5 = vld [vmem:[#allocation3_spill] sm:$0xff] }
 0x146   : > { %v1023_v59 = vadd.f32 %v991_v33, %v925_v46  ;;  %v822_v50 = vadd.f32 %v790_v24, %v724_v53  ;;  %v986_v12 = vmul.f32 %v2752_v61, %v1245_v2  ;;  %v630_v28 = vadd.f32 %v2668_v62, %v598_v15 }
 0x147   : > { %v1311_v16 = vadd.f32 %v1279_v17, %v1213_v10  ;;  %v794_v9 = vmul.f32 %v2708_v39, %v1345_v55  ;;  %1526 = vrot.lane.b32.xlu1 %v1440_v43, %s1778_s26  ;;  %v1084_v47 = vmul.f32 %v2785_v21, %v1343_v42  ;;  %v1183_v44 = vmul.f32 %v2844_v7, %v1149_v35  ;;  %v1485_v35 = vpop.permute.xlu0 %1484 }
 0x148   : > { %v1121_v3 = vadd.f32 %v1089_v29, %v1023_v59  ;;  %v920_v51 = vadd.f32 %v888_v58, %v822_v50  ;;  %v1281_v22 = vmul.f32 %v2850_v19, %v1247_v1  ;;  %v728_v36 = vadd.f32 %v696_v8, %v630_v28  ;;  %v3373_v29 = vld [vmem:[#allocation19_spill] sm:$0xff] }
 0x149   : > { %v1409_v4 = vadd.f32 %v1377_v23, %v1311_v16  ;;  %v892_v17 = vmul.f32 %v2715_v26, %v858_v56  ;;  %v600_v60 = vmul.f32 %v2651_v18, %v858_v56  ;;  %v698_v37 = vmul.f32 %v2697_v6, %v956_v38  ;;  %v3379_v50 = vld [vmem:[#allocation7_spill] sm:$0xff] }
 0x14a   : > { %v1220_v2 = vadd.f32 %v1188_v54, %v1121_v3  ;;  %v1018_v41 = vadd.f32 %v986_v12, %v920_v51  ;;  %v1379_v14 = vmul.f32 %v2885_v48, %v1345_v55  ;;  %v826_v30 = vadd.f32 %v794_v9, %v728_v36  ;;  %v3381_v56 = vld [vmem:[#allocation11_spill] sm:$0xff] }
 0x14b   : > { %v1441_v42 = vmax.f32 %v1409_v4, 0.0  ;;  %v990_v33 = vmul.f32 %v2752_v61, %v956_v38  ;;  %v632_v20 = vadd.f32 %v2668_v62, %v600_v60  ;;  %v796_v34 = vmul.f32 %v2708_v39, %v1054_v25 }
 0x14c   : > { %v1318_v57 = vadd.f32 %v1286_v49, %v1220_v2  ;;  %v1116_v40 = vadd.f32 %v1084_v47, %v1018_v41  ;;  %v924_v18 = vadd.f32 %v892_v17, %v826_v30  ;;  %v1088_v6 = vmul.f32 %v2785_v21, %v1054_v25  ;;  %v3383_v2 = vld [vmem:[#allocation23_spill] sm:$0xff] }
 0x14d   : > { %1528 = vrot.lane.b32.xlu2 %v1441_v42, %s1778_s26  ;;  %v1187_v63 = vmul.f32 %v2844_v7, %v1153_v13  ;;  %v894_v24 = vmul.f32 %v2715_v26, %v1153_v13  ;;  %v730_v39 = vadd.f32 %v698_v37, %v632_v20  ;;  %v992_v31 = vmul.f32 %v2752_v61, %v1251_v52  ;;  %v3377_v61 = vld [vmem:[#allocation17_spill] sm:$0xff] }
 0x14e   : > { %v1416_v62 = vadd.f32 %v1384_v27, %v1318_v57  ;;  %v1215_v1 = vadd.f32 %v1183_v44, %v1116_v40  ;;  %v1022_v23 = vadd.f32 %v990_v33, %v924_v18  ;;  %v3374_v26 = vmax.f32 %v3373_v29, 0.0  ;;  %v1253_v44 = vld [vmem:[#allocation2 + $0x1a1] sm:$0xff]  ;;  %v3387_v57 = vld [vmem:[#allocation12_spill] sm:$0xff] }
 0x14f   : > { %v3376_v46 = vmax.f32 %v3375_v5, 0.0  ;;  %v828_v27 = vadd.f32 %v796_v34, %v730_v39  ;;  %v3378_v15 = vmax.f32 %v3377_v61, 0.0  ;;  %v1285_v59 = vmul.f32 %v2850_v19, %v1251_v52  ;;  %v3395_v5 = vld [vmem:[#allocation39_spill] sm:$0xff] }
 0x150   : > { %v1589_v54 = vsel %vm279_vm1, %v3374_v26, %v2967_v0  ;;  %v1448_v55 = vmax.f32 %v1416_v62, 0.0  ;;  %v1313_v10 = vadd.f32 %v1281_v22, %v1215_v1  ;;  %v1120_v43 = vadd.f32 %v1088_v6, %v1022_v23  ;;  %v1155_v0 = vld [vmem:[#allocation2 + $0x1a0] sm:$0xff]  ;;  %v3391_v1 = vld [vmem:[#allocation31_spill] sm:$0xff] }
 0x151   : > { %v1578_v49 = vsel %vm279_vm1, %v3376_v46, %v1483_v45  ;;  %v1487_v53 = vpop.permute.xlu1 %1486  ;;  %1622 = vst.msk [vmem:[%s3009_s28 + $0x58] sm:$0xff] %vm1610_vm4, %v1589_v54  ;;  %v1604_v8 = vsel %vm279_vm1, %v3378_v15, %v1535_v32  ;;  %v3380_v45 = vmax.f32 %v3379_v50, 0.0  ;;  %v3382_v16 = vmax.f32 %v3381_v56, 0.0  ;;  %v3385_v32 = vld [vmem:[#allocation15_spill] sm:$0xff]  ;;  %v3399_v15 = vld [vmem:[#allocation21_spill] sm:$0xff]  ;;  %v3401_v50 = vld [vmem:[#allocation38_spill] sm:$0xff] }
 0x152   : > { %1611 = vst.msk [vmem:[%s3009_s28] sm:$0xff] %vm1610_vm4, %v1578_v49  ;;  %1542 = vrot.lane.b32.xlu0 %v1448_v55, %s1778_s26  ;;  %v1411_v28 = vadd.f32 %v1379_v14, %v1313_v10  ;;  %v926_v9 = vadd.f32 %v894_v24, %v828_v27  ;;  %v1090_v3 = vmul.f32 %v2785_v21, %v1349_v11  ;;  %v1351_v21 = vld [vmem:[#allocation2 + $0x1a2] sm:$0xff]  ;;  %v3384_v41 = vmax.f32 %v3383_v2, 0.0  ;;  %v3397_v55 = vld [vmem:[#allocation24_spill] sm:$0xff] }
 0x153   : > { %v1579_v58 = vsel %vm279_vm1, %v3380_v45, %v1485_v35  ;;  %v1580_v12 = vsel %vm279_vm1, %v3382_v16, %v1487_v53  ;;  %1637 = vst.msk [vmem:[%s3009_s28 + $0xd0] sm:$0xff] %vm1610_vm4, %v1604_v8  ;;  %v1219_v51 = vadd.f32 %v1187_v63, %v1120_v43  ;;  %v1383_v47 = vmul.f32 %v2885_v48, %v1349_v11  ;;  %v1491_v36 = vpop.permute.xlu2 %1490  ;;  %v3389_v24 = vld [vmem:[#allocation22_spill] sm:$0xff]  ;;  %v3403_v56 = vld [vmem:[#allocation29_spill] sm:$0xff] }
 0x154   : > { %1612 = vst.msk [vmem:[%s3009_s28 + $0x8] sm:$0xff] %vm1610_vm4, %v1579_v58  ;;  %v1443_v38 = vmax.f32 %v1411_v28, 0.0  ;;  %v1024_v4 = vadd.f32 %v992_v31, %v926_v9  ;;  %v1189_v22 = vmul.f32 %v2844_v7, %v1155_v0  ;;  %v1582_v25 = vsel %vm279_vm1, %v3384_v41, %v1491_v36  ;;  %v1519_v13 = vpop.permute.xlu0 %1518  ;;  %v3393_v11 = vld [vmem:[#allocation18_spill] sm:$0xff]  ;;  %v3405_v9 = vld [vmem:[#allocation33_spill] sm:$0xff] }
 0x155   : > { %1613 = vst.msk [vmem:[%s3009_s28 + $0x10] sm:$0xff] %vm1610_vm4, %v1580_v12  ;;  %v1317_v17 = vadd.f32 %v1285_v59, %v1219_v51  ;;  %v1287_v37 = vmul.f32 %v2850_v19, %v1253_v44  ;;  %v3386_v7 = vmax.f32 %v3385_v32, 0.0  ;;  %v1385_v52 = vmul.f32 %v2885_v48, %v1351_v21  ;;  %v3407_v44 = vld [vmem:[#allocation4_spill] sm:$0xff]  ;;  %v3409_v36 = vld [vmem:[#allocation49_spill] sm:$0xff]  ;;  %v3411_v41 = vld [vmem:[#allocation30_spill] sm:$0xff] }
 0x156   : > { %1532 = vrot.lane.b32.xlu1 %v1443_v38, %s1778_s26  ;;  %v1122_v60 = vadd.f32 %v1090_v3, %v1024_v4  ;;  %1615 = vst.msk [vmem:[%s3009_s28 + $0x20] sm:$0xff] %vm1610_vm4, %v1582_v25  ;;  %v3388_v40 = vmax.f32 %v3387_v57, 0.0  ;;  %v3390_v35 = vmax.f32 %v3389_v24, 0.0  ;;  %v3392_v39 = vmax.f32 %v3391_v1, 0.0  ;;  %v3413_v32 = vld [vmem:[#allocation9_spill] sm:$0xff]  ;;  %v3417_v57 = vld [vmem:[#allocation48_spill] sm:$0xff] }
 0x157   : > { %v1596_v42 = vsel %vm279_vm1, %v3386_v7, %v1519_v13  ;;  %v1415_v14 = vadd.f32 %v1383_v47, %v1317_v17  ;;  %v3394_v29 = vmax.f32 %v3393_v11, 0.0  ;;  %v3396_v46 = vmax.f32 %v3395_v5, 0.0  ;;  %v3421_v24 = vld [vmem:[#allocation8_spill] sm:$0xff]  ;;  %v3423_v1 = vld [vmem:[#allocation5_spill] sm:$0xff]  ;;  %v3427_v5 = vld [vmem:[#allocation6_spill] sm:$0xff] }
 0x158   : > { %1629 = vst.msk [vmem:[%s3009_s28 + $0x90] sm:$0xff] %vm1610_vm4, %v1596_v42  ;;  %v1221_v33 = vadd.f32 %v1189_v22, %v1122_v60  ;;  %v3398_v10 = vmax.f32 %v3397_v55, 0.0  ;;  %v3400_v8 = vmax.f32 %v3399_v15, 0.0  ;;  %v3402_v45 = vmax.f32 %v3401_v50, 0.0  ;;  %v3429_v55 = vld [vmem:[#allocation46_spill] sm:$0xff]  ;;  %v3431_v15 = vld [vmem:[#allocation47_spill] sm:$0xff] }
 0x159   : > { %v1503_v30 = vpop.permute.xlu1 %1502  ;;  %v1447_v19 = vmax.f32 %v1415_v14, 0.0  ;;  %v3404_v16 = vmax.f32 %v3403_v56, 0.0  ;;  %v3406_v3 = vmax.f32 %v3405_v9, 0.0  ;;  %v3408_v38 = vmax.f32 %v3407_v44, 0.0  ;;  %v3415_v14 = vld [vmem:[#allocation36_spill] sm:$0xff]  ;;  %v3435_v56 = vld [vmem:[#allocation53_spill] sm:$0xff] }
 0x15a   : > { %v1588_v20 = vsel %vm279_vm1, %v3388_v40, %v1503_v30  ;;  %v1319_v34 = vadd.f32 %v1287_v37, %v1221_v33  ;;  %v3410_v17 = vmax.f32 %v3409_v36, 0.0  ;;  %v3412_v25 = vmax.f32 %v3411_v41, 0.0 }
 0x15b   : > { %1621 = vst.msk [vmem:[%s3009_s28 + $0x50] sm:$0xff] %vm1610_vm4, %v1588_v20  ;;  %1540 = vrot.lane.b32.xlu2 %v1447_v19, %s1778_s26  ;;  %v3414_v7 = vmax.f32 %v3413_v32, 0.0  ;;  %v3416_v30 = vmax.f32 %v3415_v14, 0.0  ;;  %v3418_v40 = vmax.f32 %v3417_v57, 0.0 }
 0x15c   : > { %v1417_v18 = vadd.f32 %v1385_v52, %v1319_v34  ;;  %v1537_v6 = vpop.permute.xlu0 %1536 }
 0x15d   : > { %v1605_v48 = vsel %vm279_vm1, %v3390_v35, %v1537_v6  ;;  %v3422_v35 = vmax.f32 %v3421_v24, 0.0 }
 0x15e   : > { %v1449_v63 = vmax.f32 %v1417_v18, 0.0  ;;  %1638 = vst.msk [vmem:[%s3009_s28 + $0xd8] sm:$0xff] %vm1610_vm4, %v1605_v48  ;;  %v3419_v18 = vld [vmem:[#allocation52_spill] sm:$0xff] }
 0x15f   : > { %v1493_v62 = vpop.permute.xlu2 %1492  ;;  %v3420_v6 = vmax.f32 %v3419_v18, 0.0 }
 0x160   : > { %1544 = vrot.lane.b32.xlu1 %v1449_v63, %s1778_s26  ;;  %v1583_v31 = vsel %vm279_vm1, %v3392_v39, %v1493_v62  ;;  %v3424_v39 = vmax.f32 %v3423_v1, 0.0 }
 0x161   : > { %1616 = vst.msk [vmem:[%s3009_s28 + $0x28] sm:$0xff] %vm1610_vm4, %v1583_v31  ;;  %v1489_v23 = vpop.permute.xlu1 %1488 }
 0x162   : > { %v1581_v26 = vsel %vm279_vm1, %v3394_v29, %v1489_v23  ;;  %v3425_v29 = vld [vmem:[#allocation37_spill] sm:$0xff] }
 0x163   : > { %1614 = vst.msk [vmem:[%s3009_s28 + $0x18] sm:$0xff] %vm1610_vm4, %v1581_v26  ;;  %v3426_v26 = vmax.f32 %v3425_v29, 0.0 }
 0x16e   : > { %v1511_v54 = vpop.permute.xlu2 %1510 }
 0x16f   : > { %v1592_v49 = vsel %vm279_vm1, %v3396_v46, %v1511_v54  ;;  %v1507_v53 = vpop.permute.xlu0 %1506  ;;  %v3428_v46 = vmax.f32 %v3427_v5, 0.0 }
 0x170   : > { %1625 = vst.msk [vmem:[%s3009_s28 + $0x70] sm:$0xff] %vm1610_vm4, %v1592_v49  ;;  %v1590_v27 = vsel %vm279_vm1, %v3398_v10, %v1507_v53  ;;  %v3430_v10 = vmax.f32 %v3429_v55, 0.0 }
 0x171   : > { %1623 = vst.msk [vmem:[%s3009_s28 + $0x60] sm:$0xff] %vm1610_vm4, %v1590_v27 }
 0x173   : > { %v1521_v61 = vpop.permute.xlu1 %1520 }
 0x174   : > { %v1597_v43 = vsel %vm279_vm1, %v3400_v8, %v1521_v61  ;;  %v3432_v8 = vmax.f32 %v3431_v15, 0.0 }
 0x175   : > { %1630 = vst.msk [vmem:[%s3009_s28 + $0x98] sm:$0xff] %vm1610_vm4, %v1597_v43 }
 0x17a   : > { %v1495_v59 = vpop.permute.xlu0 %1494 }
 0x17b   : > { %v1523_v0 = vpop.permute.xlu2 %1522  ;;  %v1584_v58 = vsel %vm279_vm1, %v3402_v45, %v1495_v59 }
 0x17c   : > { %v1598_v12 = vsel %vm279_vm1, %v3404_v16, %v1523_v0  ;;  %1617 = vst.msk [vmem:[%s3009_s28 + $0x30] sm:$0xff] %vm1610_vm4, %v1584_v58  ;;  %v3433_v0 = vld [vmem:[#allocation10_spill] sm:$0xff]  ;;  %v3436_v16 = vmax.f32 %v3435_v56, 0.0 }
 0x17d   : > { %1631 = vst.msk [vmem:[%s3009_s28 + $0xa0] sm:$0xff] %vm1610_vm4, %v1598_v12  ;;  %v3434_v50 = vmax.f32 %v3433_v0, 0.0 }
 0x180   : > { %v1509_v28 = vpop.permute.xlu1 %1508 }
 0x181   : > { %v1591_v51 = vsel %vm279_vm1, %v3406_v3, %v1509_v28 }
 0x182   : > { %1624 = vst.msk [vmem:[%s3009_s28 + $0x68] sm:$0xff] %vm1610_vm4, %v1591_v51 }
 0x18a   : > { %v1499_v47 = vpop.permute.xlu2 %1498 }
 0x18b   : > { %v1586_v4 = vsel %vm279_vm1, %v3408_v38, %v1499_v47  ;;  %v1513_v22 = vpop.permute.xlu0 %1512 }
 0x18c   : > { %1619 = vst.msk [vmem:[%s3009_s28 + $0x40] sm:$0xff] %vm1610_vm4, %v1586_v4  ;;  %v1593_v21 = vsel %vm279_vm1, %v3410_v17, %v1513_v22 }
 0x18d   : > { %1626 = vst.msk [vmem:[%s3009_s28 + $0x78] sm:$0xff] %vm1610_vm4, %v1593_v21 }
 0x18f   : > { %v1539_v2 = vpop.permute.xlu1 %1538 }
 0x190   : > { %v1606_v13 = vsel %vm279_vm1, %v3412_v25, %v1539_v2 }
 0x191   : > { %1639 = vst.msk [vmem:[%s3009_s28 + $0xe0] sm:$0xff] %vm1610_vm4, %v1606_v13 }
 0x198   : > { %v1517_v60 = vpop.permute.xlu2 %1516 }
 0x199   : > { %v1525_v37 = vpop.permute.xlu0 %1524  ;;  %v1595_v42 = vsel %vm279_vm1, %v3414_v7, %v1517_v60 }
 0x19a   : > { %v1599_v33 = vsel %vm279_vm1, %v3416_v30, %v1525_v37  ;;  %1628 = vst.msk [vmem:[%s3009_s28 + $0x88] sm:$0xff] %vm1610_vm4, %v1595_v42 }
 0x19b   : > { %1632 = vst.msk [vmem:[%s3009_s28 + $0xa8] sm:$0xff] %vm1610_vm4, %v1599_v33 }
 0x19c   : > { %v1497_v52 = vpop.permute.xlu1 %1496 }
 0x19d   : > { %v1585_v20 = vsel %vm279_vm1, %v3418_v40, %v1497_v52 }
 0x19e   : > { %1618 = vst.msk [vmem:[%s3009_s28 + $0x38] sm:$0xff] %vm1610_vm4, %v1585_v20 }
 0x1a7   : > { %v1529_v19 = vpop.permute.xlu2 %1528  ;;  %v1501_v34 = vpop.permute.xlu0 %1500 }
 0x1a8   : > { %v1601_v63 = vsel %vm279_vm1, %v3420_v6, %v1529_v19  ;;  %v1587_v48 = vsel %vm279_vm1, %v3422_v35, %v1501_v34 }
 0x1a9   : > { %1634 = vst.msk [vmem:[%s3009_s28 + $0xb8] sm:$0xff] %vm1610_vm4, %v1601_v63 }
 0x1aa   : > { %1620 = vst.msk [vmem:[%s3009_s28 + $0x48] sm:$0xff] %vm1610_vm4, %v1587_v48 }
 0x1ac   : > { %v1515_v62 = vpop.permute.xlu1 %1514 }
 0x1ad   : > { %v1594_v31 = vsel %vm279_vm1, %v3424_v39, %v1515_v62 }
 0x1ae   : > { %1627 = vst.msk [vmem:[%s3009_s28 + $0x80] sm:$0xff] %vm1610_vm4, %v1594_v31 }
 0x1b5   : > { %v1541_v23 = vpop.permute.xlu2 %1540  ;;  %v1531_v11 = vpop.permute.xlu0 %1530 }
 0x1b6   : > { %v1607_v54 = vsel %vm279_vm1, %v3426_v26, %v1541_v23  ;;  %v1602_v49 = vsel %vm279_vm1, %v3428_v46, %v1531_v11 }
 0x1b7   : > { %1640 = vst.msk [vmem:[%s3009_s28 + $0xe8] sm:$0xff] %vm1610_vm4, %v1607_v54 }
 0x1b8   : > { %1635 = vst.msk [vmem:[%s3009_s28 + $0xc0] sm:$0xff] %vm1610_vm4, %v1602_v49 }
 0x1b9   : > { %v1527_v53 = vpop.permute.xlu1 %1526 }
 0x1ba   : > { %v1600_v27 = vsel %vm279_vm1, %v3430_v10, %v1527_v53 }
 0x1bb   : > { %1633 = vst.msk [vmem:[%s3009_s28 + $0xb0] sm:$0xff] %vm1610_vm4, %v1600_v27 }
 0x1c4   : > { %v1543_v61 = vpop.permute.xlu0 %1542 }
 0x1c5   : > { %v1608_v43 = vsel %vm279_vm1, %v3432_v8, %v1543_v61 }
 0x1c6   : > { %1641 = vst.msk [vmem:[%s3009_s28 + $0xf0] sm:$0xff] %vm1610_vm4, %v1608_v43 }
 0x1c8   : > { %v1533_v59 = vpop.permute.xlu1 %1532 }
 0x1c9   : > { %v1603_v45 = vsel %vm279_vm1, %v3434_v50, %v1533_v59 }
 0x1ca   : > { %1636 = vst.msk [vmem:[%s3009_s28 + $0xc8] sm:$0xff] %vm1610_vm4, %v1603_v45 }
 0x1d2   : > { %v1545_v58 = vpop.permute.xlu1 %1544 }
 0x1d3   : > { %v1609_v12 = vsel %vm279_vm1, %v3436_v16, %v1545_v58 }
 0x1d4   : > { %1642 = vst.msk [vmem:[%s3009_s28 + $0xf8] sm:$0xff] %vm1610_vm4, %v1609_v12 }
 0x1d5 PF: > { %s15_s18 = sadd.s32 1, %s1775_s18  }
 0x1d6   : > { %p12_p4 = scmp.ge.s32.totalorder %s15_s18, 4  }
 0x1d8   :  { %14 = sbr.rel (!%p12_p4) target bundleno = 1 (0x1), region = 73 }

</bundles_post_ra>
